<compile_context>
chip_gen: v5e
topology: v5e:2x2
jax: 0.10.0
libtpu: 0.0.40
codegen_flags: <defaults>
</compile_context>

<pallas_src>
import functools

import jax
import jax.numpy as jnp
from jax import lax
from jax.experimental import pallas as pl
from jax.experimental.pallas import tpu as pltpu


# ----------------------------------------------------------------------------
# helpers
# ----------------------------------------------------------------------------

def _pick_tm(M, cap=256):
    """Largest row tile: all of M when small, else a divisor of M <= cap
    (preferring multiples of 8 for sublane alignment)."""
    if M <= cap:
        return M
    best = None
    for tm in range(cap, 0, -1):
        if M % tm == 0:
            if tm % 8 == 0:
                return tm
            if best is None:
                best = tm
    return best if best is not None else M


# ----------------------------------------------------------------------------
# Pallas kernels
# ----------------------------------------------------------------------------

def expert_layer_kernel(x_ref, wqkv_ref, bqkv_ref, wo_ref, bo_ref,
                        lng_ref, lnb_ref, w1_ref, b1_ref, w2_ref, b2_ref,
                        o_ref, *, n_head, block_size_kv, use_approx):
    """One fused expert layer for one (expert, batch) grid step.

    x(T,C) -> QKV (one (C,3C) matmul) -> per-head FlashAttention3 (no score
    scaling, no mask, O NOT rescaled - faithful to the PyTorch reference)
    -> out_proj -> LayerNorm -> MLP(c_fc -> tanh GELU -> c_proj).
    Matmul operands use the weight dtype (bf16 or f32); accumulation and all
    elementwise math are f32.  Dropout (p=0.0 / eval) is identity.
    """
    cdt = wqkv_ref.dtype                                   # compute dtype (MXU operands)
    T, C = x_ref.shape[2], x_ref.shape[3]
    D = C // n_head

    x = x_ref[0, 0].astype(cdt)                            # (T, C)
    qkv = jnp.dot(x, wqkv_ref[0],
                  preferred_element_type=jnp.float32) + bqkv_ref[0]   # (T, 3C) f32
    qkv_c = qkv.astype(cdt)

    bk = min(block_size_kv, T)
    nkv = (T + bk - 1) // bk                               # static; ==1 when T<=32

    # attention + out_proj fused: y = sum_h O_h @ Wo[h*D:(h+1)*D, :]
    y = jnp.zeros((T, C), jnp.float32)
    for h in range(n_head):                                # tiny static head loop
        q_h = qkv_c[:, h * D:(h + 1) * D]                  # (T, D)
        k_h = qkv_c[:, C + h * D:C + (h + 1) * D]          # (T, D)
        v_h = qkv_c[:, 2 * C + h * D:2 * C + (h + 1) * D]  # (T, D)

        o_h = jnp.zeros((T, D), jnp.float32)
        l_h = jnp.zeros((T, 1), jnp.float32)
        m_h = jnp.full((T, 1), -jnp.inf, jnp.float32)
        for j in range(nkv):                               # static kv-block loop (nkv==1 here)
            kb = k_h[j * bk:(j + 1) * bk, :]
            vb = v_h[j * bk:(j + 1) * bk, :]
            # contract D of both operands directly (no K transpose / XLU)
            s = lax.dot_general(q_h, kb, (((1,), (1,)), ((), ())),
                                preferred_element_type=jnp.float32)   # (T, bk)
            m_old = m_h
            m_h = jnp.maximum(m_h, jnp.max(s, axis=-1, keepdims=True))
            p = jnp.exp(s - m_h)
            l_h = jnp.exp(m_old - m_h) * l_h + jnp.sum(p, axis=-1, keepdims=True)
            # NOTE: O is deliberately NOT rescaled by exp(m_old-m_h): matches
            # the PyTorch reference verbatim (exact softmax while nkv == 1).
            o_h = o_h + jnp.dot(p.astype(cdt), vb,
                                preferred_element_type=jnp.float32)
        if use_approx:
            o_h = o_h * pl.reciprocal(l_h, approx=True)    # EUP slot (bf16 path)
        else:
            o_h = o_h / l_h                                # exact (f32 verification path)
        # out_proj contribution of this head
        y = y + jnp.dot(o_h.astype(cdt), wo_ref[0, h * D:(h + 1) * D, :],
                        preferred_element_type=jnp.float32)
    y = y + bo_ref[0]                                      # (T, C) f32

    # LayerNorm (torch default: biased variance, eps=1e-5), f32
    mu = jnp.mean(y, axis=-1, keepdims=True)
    var = jnp.mean((y - mu) ** 2, axis=-1, keepdims=True)
    yn = (y - mu) * lax.rsqrt(var + 1e-5) * lng_ref[0] + lnb_ref[0]

    # MLP: c_fc -> tanh GELU -> c_proj (dropout p=0.0 is identity)
    h1 = jnp.dot(yn.astype(cdt), w1_ref[0],
                 preferred_element_type=jnp.float32) + b1_ref[0]       # (T, 4C)
    c0 = jnp.float32(0.7978845608028654)                   # sqrt(2/pi)
    h1 = 0.5 * h1 * (1.0 + jnp.tanh(c0 * (h1 + 0.044715 * (h1 * h1 * h1))))
    out = jnp.dot(h1.astype(cdt), w2_ref[0],
                  preferred_element_type=jnp.float32) + b2_ref[0]      # (T, C)

    o_ref[0, 0] = out.astype(o_ref.dtype)


def gate_combine_kernel(x_ref, gw_ref, gb_ref, eo_ref, o_ref,
                        *, num_experts, use_approx):
    """Fused gate linear + softmax + weighted sum over expert outputs."""
    cdt = gw_ref.dtype
    x = x_ref[...].astype(cdt)                             # (tm, C)
    g = jnp.dot(x, gw_ref[...],
                preferred_element_type=jnp.float32) + gb_ref[...]      # (tm, E)
    g = g - jnp.max(g, axis=-1, keepdims=True)
    ge = jnp.exp(g)
    denom = jnp.sum(ge, axis=-1, keepdims=True)
    if use_approx:
        gp = ge * pl.reciprocal(denom, approx=True)
    else:
        gp = ge / denom                                    # (tm, E) f32
    out = jnp.zeros(o_ref.shape, jnp.float32)
    for e in range(num_experts):                           # tiny static loop
        out = out + gp[:, e:e + 1] * eo_ref[e]             # (tm, C)
    o_ref[...] = out.astype(o_ref.dtype)


# ----------------------------------------------------------------------------
# Pallas wrappers
# ----------------------------------------------------------------------------

def expert_layer(xe, lyr, n_head, cdt, shared, use_approx, block_size_kv=32):
    """xe: (1 or E, B, T, C) f32; weights carry a leading expert axis.
    Returns (E, B, T, C) f32."""
    E = lyr['wqkv'].shape[0]
    _, B, T, C = xe.shape
    H4 = lyr['w1'].shape[2]

    # layer 0 shares the same x across experts -> index_map ignores e and the
    # broadcast is never materialized in HBM
    x_map = (lambda e, b: (0, b, 0, 0)) if shared else (lambda e, b: (e, b, 0, 0))
    wmap = lambda e, b: (e, 0, 0)                          # weights: re-DMA only on new expert

    kern = functools.partial(expert_layer_kernel, n_head=n_head,
                             block_size_kv=block_size_kv, use_approx=use_approx)
    return pl.pallas_call(
        kern,
        out_shape=jax.ShapeDtypeStruct((E, B, T, C), jnp.float32),
        grid=(E, B),
        in_specs=[
            pl.BlockSpec((1, 1, T, C), x_map),
            pl.BlockSpec((1, C, 3 * C), wmap),
            pl.BlockSpec((1, 1, 3 * C), wmap),
            pl.BlockSpec((1, C, C), wmap),
            pl.BlockSpec((1, 1, C), wmap),
            pl.BlockSpec((1, 1, C), wmap),
            pl.BlockSpec((1, 1, C), wmap),
            pl.BlockSpec((1, C, H4), wmap),
            pl.BlockSpec((1, 1, H4), wmap),
            pl.BlockSpec((1, H4, C), wmap),
            pl.BlockSpec((1, 1, C), wmap),
        ],
        out_specs=pl.BlockSpec((1, 1, T, C), lambda e, b: (e, b, 0, 0)),
        compiler_params=pltpu.CompilerParams(
            dimension_semantics=("parallel", "parallel")),
    )(xe,
      lyr['wqkv'].astype(cdt), lyr['bqkv'],
      lyr['wo'].astype(cdt), lyr['bo'],
      lyr['ln_g'], lyr['ln_b'],
      lyr['w1'].astype(cdt), lyr['b1'],
      lyr['w2'].astype(cdt), lyr['b2'])


def gate_combine(x_flat, gate_w, gate_b, expert_outs, use_approx):
    # x_flat: (M, C) f32, gate_w: (C, E) cdt, gate_b: (1, E) f32,
    # expert_outs: (E, M, C) f32 -> (M, C) f32
    M, C = x_flat.shape
    E = gate_w.shape[1]
    tm = _pick_tm(M)
    assert M % tm == 0
    kern = functools.partial(gate_combine_kernel, num_experts=E,
                             use_approx=use_approx)
    return pl.pallas_call(
        kern,
        out_shape=jax.ShapeDtypeStruct((M, C), jnp.float32),
        grid=(M // tm,),
        in_specs=[pl.BlockSpec((tm, C), lambda i: (i, 0)),
                  pl.BlockSpec((C, E), lambda i: (0, 0)),
                  pl.BlockSpec((1, E), lambda i: (0, 0)),
                  pl.BlockSpec((E, tm, C), lambda i: (0, i, 0))],
        out_specs=pl.BlockSpec((tm, C), lambda i: (i, 0)),
        compiler_params=pltpu.CompilerParams(dimension_semantics=("parallel",)),
    )(x_flat, gate_w, gate_b, expert_outs)


# ----------------------------------------------------------------------------
# Model glue (only reshapes of contiguous data) in plain JAX
# ----------------------------------------------------------------------------

@functools.partial(jax.jit, static_argnums=(2, 3))
def moe_forward(kparams, x, n_head, compute_dtype=jnp.float32):
    B, T, C = x.shape
    M = B * T
    layers = kparams['layers']
    cdt = compute_dtype
    use_approx = (compute_dtype != jnp.float32)

    xe = x.reshape(1, B, T, C)          # shared across experts for layer 0
    shared = True
    for lyr in layers:
        xe = expert_layer(xe, lyr, n_head, cdt, shared, use_approx)   # (E, B, T, C)
        shared = False

    E = xe.shape[0]
    gw, gb = kparams['gate']
    out = gate_combine(x.reshape(M, C), gw.astype(cdt), gb,
                       xe.reshape(E, M, C), use_approx)               # (M, C)
    return out.reshape(B, T, C)


# ----------------------------------------------------------------------------
# Deterministic parameter init + stacking
# ----------------------------------------------------------------------------

def make_linear_params(key, d_in, d_out):
    k1, k2 = jax.random.split(key)
    w = 0.02 * jax.random.normal(k1, (d_in, d_out), jnp.float32)
    b = 0.02 * jax.random.normal(k2, (1, d_out), jnp.float32)
    return (w, b)


def init_params(key, n_embd, num_experts, expert_layers):
    params = {'experts': []}
    key, kg = jax.random.split(key)
    params['gate'] = make_linear_params(kg, n_embd, num_experts)
    for _ in range(num_experts):
        layers = []
        for _ in range(expert_layers):
            key, kq, kk, kv, ko, k1, k2 = jax.random.split(key, 7)
            layers.append({
                'q': make_linear_params(kq, n_embd, n_embd),
                'k': make_linear_params(kk, n_embd, n_embd),
                'v': make_linear_params(kv, n_embd, n_embd),
                'o': make_linear_params(ko, n_embd, n_embd),
                'ln_g': jnp.ones((1, n_embd), jnp.float32),
                'ln_b': jnp.zeros((1, n_embd), jnp.float32),
                'w1': make_linear_params(k1, n_embd, 4 * n_embd),
                'w2': make_linear_params(k2, 4 * n_embd, n_embd),
            })
        params['experts'].append(layers)
    return params


def stack_expert_params(experts):
    """Stack per-expert weights along a leading expert axis (one kernel chain
    serves all experts) and fuse Q/K/V into a single (C, 3C) projection."""
    E = len(experts)
    n_layers = len(experts[0])
    layers = []
    for l in range(n_layers):
        def st(fn, l=l):
            return jnp.stack([fn(experts[e][l]) for e in range(E)], axis=0)
        layers.append({
            'wqkv': st(lambda p: jnp.concatenate([p['q'][0], p['k'][0], p['v'][0]], axis=1)),
            'bqkv': st(lambda p: jnp.concatenate([p['q'][1], p['k'][1], p['v'][1]], axis=1)),
            'wo': st(lambda p: p['o'][0]), 'bo': st(lambda p: p['o'][1]),
            'ln_g': st(lambda p: p['ln_g']), 'ln_b': st(lambda p: p['ln_b']),
            'w1': st(lambda p: p['w1'][0]), 'b1': st(lambda p: p['w1'][1]),
            'w2': st(lambda p: p['w2'][0]), 'b2': st(lambda p: p['w2'][1]),
        })
    return layers


# ----------------------------------------------------------------------------
# Pure-JAX reference (mirrors the PyTorch forward) for verification
# ----------------------------------------------------------------------------

def reference_forward(params, x, n_head):
    B, T, C = x.shape
    D = C // n_head

    def lin(y, wb):
        w, b = wb
        return y @ w + b[0]

    def expert_ref(xe, layers):
        for lyr in layers:
            xf = xe.reshape(B * T, C)

            def sh(y):
                return y.reshape(B, T, n_head, D).transpose(0, 2, 1, 3)

            q, k, v = sh(lin(xf, lyr['q'])), sh(lin(xf, lyr['k'])), sh(lin(xf, lyr['v']))
            s = jnp.einsum('bhqd,bhkd->bhqk', q, k)        # no scaling, no mask
            p = jax.nn.softmax(s, axis=-1)                 # T <= block_size_kv -> exact match
            o = jnp.einsum('bhqk,bhkd->bhqd', p, v)
            o = o.transpose(0, 2, 1, 3).reshape(B * T, C)
            o = lin(o, lyr['o'])
            mu = jnp.mean(o, axis=-1, keepdims=True)
            var = jnp.mean((o - mu) ** 2, axis=-1, keepdims=True)
            o = (o - mu) * lax.rsqrt(var + 1e-5) * lyr['ln_g'][0] + lyr['ln_b'][0]
            h = jax.nn.gelu(lin(o, lyr['w1']), approximate=True)
            o = lin(h, lyr['w2'])
            xe = o.reshape(B, T, C)
        return xe

    E = len(params['experts'])
    gate = jax.nn.softmax(lin(x.reshape(B * T, C), params['gate']), axis=-1)
    eo = jnp.stack([expert_ref(x, params['experts'][e]).reshape(B * T, C) for e in range(E)], 0)
    out = jnp.einsum('me,emc->mc', gate, eo)
    return out.reshape(B, T, C)


# ----------------------------------------------------------------------------

if __name__ == "__main__":
    # small config consistent with the module: n_embd=32, n_head=4, dropout=0.0
    B, T, C, H = 2, 8, 32, 4
    NUM_EXPERTS, EXPERT_LAYERS = 2, 1

    key = jax.random.PRNGKey(0)
    key, kx, kp = jax.random.split(key, 3)
    x = jax.random.normal(kx, (B, T, C), jnp.float32)
    params = init_params(kp, C, NUM_EXPERTS, EXPERT_LAYERS)

    kparams = {'gate': params['gate'],
               'layers': stack_expert_params(params['experts'])}

    ref = reference_forward(params, x, H)

    # --- f32 MXU path: tight semantic check against the reference -----------
    out_f32 = jax.block_until_ready(moe_forward(kparams, x, H, jnp.float32))
    assert out_f32.shape == (B, T, C)
    err32 = float(jnp.max(jnp.abs(out_f32 - ref)))
    assert jnp.allclose(out_f32, ref, atol=2e-4, rtol=2e-4), f"f32 max abs err {err32}"

    # --- bf16 MXU path (perf config): bf16 operands, f32 accumulation -------
    out_bf16 = jax.block_until_ready(moe_forward(kparams, x, H, jnp.bfloat16))
    assert out_bf16.shape == (B, T, C)
    errbf = float(jnp.max(jnp.abs(out_bf16 - ref)))
    assert jnp.allclose(out_bf16, ref, atol=2e-2, rtol=2e-2), f"bf16 max abs err {errbf}"

    print("KERNEL_OK")
</pallas_src>

<mosaic_0001>
module attributes {stable_mosaic.version = 11 : i64} {
  func.func @gate_combine_kernel(%arg0: i32, %arg1: memref<16x32xf32, #tpu.memory_space<vmem>>, %arg2: memref<32x2xf32, #tpu.memory_space<vmem>>, %arg3: memref<1x2xf32, #tpu.memory_space<vmem>>, %arg4: memref<2x16x32xf32, #tpu.memory_space<vmem>>, %arg5: memref<16x32xf32, #tpu.memory_space<vmem>>) attributes {dimension_semantics = [#tpu.dimension_semantics<parallel>], iteration_bounds = array<i64: 1>, scalar_prefetch = 0 : i64, scratch_operands = 0 : i64, tpu.core_type = #tpu.core_type<tc>, window_params = [{transform_indices = @transform_0, window_bounds = array<i64: 16, 32>}, {pipeline_mode = #tpu.pipeline_mode<synchronous>, transform_indices = @transform_1, window_bounds = array<i64: 32, 2>}, {pipeline_mode = #tpu.pipeline_mode<synchronous>, transform_indices = @transform_2, window_bounds = array<i64: 1, 2>}, {transform_indices = @transform_3, window_bounds = array<i64: 2, 16, 32>}, {transform_indices = @transform_4, window_bounds = array<i64: 16, 32>}]} {
    %c0 = arith.constant 0 : index
    %c0_0 = arith.constant 0 : index
    %0 = vector.load %arg1[%c0, %c0_0] : memref<16x32xf32, #tpu.memory_space<vmem>>, vector<16x32xf32>
    %c0_1 = arith.constant 0 : index
    %c0_2 = arith.constant 0 : index
    %1 = vector.load %arg2[%c0_1, %c0_2] : memref<32x2xf32, #tpu.memory_space<vmem>>, vector<32x2xf32>
    %cst = arith.constant dense<0.000000e+00> : vector<16x2xf32>
    %2 = tpu.matmul %0, %1, %cst {dimension_numbers = #tpu.dot_dimension_numbers<[1], [0], [0], [1], [0, 0, 1, 1], [], []>} : vector<16x32xf32>, vector<32x2xf32>, vector<16x2xf32> -> vector<16x2xf32>
    %c0_3 = arith.constant 0 : index
    %c0_4 = arith.constant 0 : index
    %3 = vector.load %arg3[%c0_3, %c0_4] : memref<1x2xf32, #tpu.memory_space<vmem>>, vector<1x2xf32>
    %4 = vector.broadcast %3 : vector<1x2xf32> to vector<16x2xf32>
    %5 = arith.addf %2, %4 : vector<16x2xf32>
    %cst_5 = arith.constant dense<0xFF800000> : vector<16xf32>
    %6 = vector.multi_reduction <maximumf>, %5, %cst_5 [1] : vector<16x2xf32> to vector<16xf32>
    %7 = vector.shape_cast %6 : vector<16xf32> to vector<16x1xf32>
    %8 = vector.broadcast %7 : vector<16x1xf32> to vector<16x2xf32>
    %9 = arith.subf %5, %8 : vector<16x2xf32>
    %10 = math.exp %9 : vector<16x2xf32>
    %cst_6 = arith.constant dense<0.000000e+00> : vector<16xf32>
    %11 = vector.multi_reduction <add>, %10, %cst_6 [1] : vector<16x2xf32> to vector<16xf32>
    %12 = vector.shape_cast %11 : vector<16xf32> to vector<16x1xf32>
    %13 = vector.broadcast %12 : vector<16x1xf32> to vector<16x2xf32>
    %14 = arith.divf %10, %13 : vector<16x2xf32>
    %cst_7 = arith.constant 0.000000e+00 : f32
    %15 = vector.broadcast %cst_7 : f32 to vector<16x32xf32>
    %16 = vector.extract_strided_slice %14 {offsets = [0, 0], sizes = [16, 1], strides = [1, 1]} : vector<16x2xf32> to vector<16x1xf32>
    %c0_8 = arith.constant 0 : index
    %c0_9 = arith.constant 0 : index
    %c0_10 = arith.constant 0 : index
    %17 = vector.load %arg4[%c0_8, %c0_9, %c0_10] : memref<2x16x32xf32, #tpu.memory_space<vmem>>, vector<1x16x32xf32>
    %18 = vector.shape_cast %17 : vector<1x16x32xf32> to vector<16x32xf32>
    %19 = vector.broadcast %16 : vector<16x1xf32> to vector<16x32xf32>
    %20 = arith.mulf %19, %18 : vector<16x32xf32>
    %21 = arith.addf %15, %20 : vector<16x32xf32>
    %22 = vector.extract_strided_slice %14 {offsets = [0, 1], sizes = [16, 1], strides = [1, 1]} : vector<16x2xf32> to vector<16x1xf32>
    %c1 = arith.constant 1 : index
    %c0_11 = arith.constant 0 : index
    %c0_12 = arith.constant 0 : index
    %23 = vector.load %arg4[%c1, %c0_11, %c0_12] : memref<2x16x32xf32, #tpu.memory_space<vmem>>, vector<1x16x32xf32>
    %24 = vector.shape_cast %23 : vector<1x16x32xf32> to vector<16x32xf32>
    %25 = vector.broadcast %22 : vector<16x1xf32> to vector<16x32xf32>
    %26 = arith.mulf %25, %24 : vector<16x32xf32>
    %27 = arith.addf %21, %26 : vector<16x32xf32>
    %c0_13 = arith.constant 0 : index
    %c0_14 = arith.constant 0 : index
    %28 = vector.load %arg5[%c0_13, %c0_14] : memref<16x32xf32, #tpu.memory_space<vmem>>, vector<16x32xf32>
    tpu.vector_store %arg5[%c0_13, %c0_14], %27 {strides = array<i32>} : memref<16x32xf32, #tpu.memory_space<vmem>>, vector<16x32xf32>,
    return
  }
  func.func @transform_0(%arg0: i32) -> (i32, i32) {
    %c0_i32 = arith.constant 0 : i32
    %c0_i32_0 = arith.constant 0 : i32
    return %arg0, %c0_i32 : i32, i32
  }
  func.func @transform_1(%arg0: i32) -> (i32, i32) {
    %c0_i32 = arith.constant 0 : i32
    %c0_i32_0 = arith.constant 0 : i32
    %c0_i32_1 = arith.constant 0 : i32
    return %c0_i32, %c0_i32_0 : i32, i32
  }
  func.func @transform_2(%arg0: i32) -> (i32, i32) {
    %c0_i32 = arith.constant 0 : i32
    %c0_i32_0 = arith.constant 0 : i32
    %c0_i32_1 = arith.constant 0 : i32
    return %c0_i32, %c0_i32_0 : i32, i32
  }
  func.func @transform_3(%arg0: i32) -> (i32, i32, i32) {
    %c0_i32 = arith.constant 0 : i32
    %c0_i32_0 = arith.constant 0 : i32
    %c0_i32_1 = arith.constant 0 : i32
    return %c0_i32, %arg0, %c0_i32_0 : i32, i32, i32
  }
  func.func @transform_4(%arg0: i32) -> (i32, i32) {
    %c0_i32 = arith.constant 0 : i32
    %c0_i32_0 = arith.constant 0 : i32
    return %arg0, %c0_i32 : i32, i32
  }
}

module attributes {stable_mosaic.version = 11 : i64} {
  func.func @expert_layer_kernel(%arg0: i32, %arg1: i32, %arg2: memref<1x1x8x32xf32, #tpu.memory_space<vmem>>, %arg3: memref<1x32x96xf32, #tpu.memory_space<vmem>>, %arg4: memref<1x1x96xf32, #tpu.memory_space<vmem>>, %arg5: memref<1x32x32xf32, #tpu.memory_space<vmem>>, %arg6: memref<1x1x32xf32, #tpu.memory_space<vmem>>, %arg7: memref<1x1x32xf32, #tpu.memory_space<vmem>>, %arg8: memref<1x1x32xf32, #tpu.memory_space<vmem>>, %arg9: memref<1x32x128xf32, #tpu.memory_space<vmem>>, %arg10: memref<1x1x128xf32, #tpu.memory_space<vmem>>, %arg11: memref<1x128x32xf32, #tpu.memory_space<vmem>>, %arg12: memref<1x1x32xf32, #tpu.memory_space<vmem>>, %arg13: memref<1x1x8x32xf32, #tpu.memory_space<vmem>>) attributes {dimension_semantics = [#tpu.dimension_semantics<parallel>, #tpu.dimension_semantics<parallel>], iteration_bounds = array<i64: 2, 2>, scalar_prefetch = 0 : i64, scratch_operands = 0 : i64, tpu.core_type = #tpu.core_type<tc>, window_params = [{transform_indices = @transform_0, window_bounds = array<i64: 1, 1, 8, 32>}, {transform_indices = @transform_1, window_bounds = array<i64: 1, 32, 96>}, {transform_indices = @transform_2, window_bounds = array<i64: 1, 1, 96>}, {transform_indices = @transform_3, window_bounds = array<i64: 1, 32, 32>}, {transform_indices = @transform_4, window_bounds = array<i64: 1, 1, 32>}, {transform_indices = @transform_5, window_bounds = array<i64: 1, 1, 32>}, {transform_indices = @transform_6, window_bounds = array<i64: 1, 1, 32>}, {transform_indices = @transform_7, window_bounds = array<i64: 1, 32, 128>}, {transform_indices = @transform_8, window_bounds = array<i64: 1, 1, 128>}, {transform_indices = @transform_9, window_bounds = array<i64: 1, 128, 32>}, {transform_indices = @transform_10, window_bounds = array<i64: 1, 1, 32>}, {transform_indices = @transform_11, window_bounds = array<i64: 1, 1, 8, 32>}]} {
    %c0 = arith.constant 0 : index
    %c0_0 = arith.constant 0 : index
    %c0_1 = arith.constant 0 : index
    %c0_2 = arith.constant 0 : index
    %0 = vector.load %arg2[%c0, %c0_0, %c0_1, %c0_2] : memref<1x1x8x32xf32, #tpu.memory_space<vmem>>, vector<1x1x8x32xf32>
    %1 = vector.shape_cast %0 : vector<1x1x8x32xf32> to vector<8x32xf32>
    %c0_3 = arith.constant 0 : index
    %c0_4 = arith.constant 0 : index
    %c0_5 = arith.constant 0 : index
    %2 = vector.load %arg3[%c0_3, %c0_4, %c0_5] : memref<1x32x96xf32, #tpu.memory_space<vmem>>, vector<1x32x96xf32>
    %3 = vector.shape_cast %2 : vector<1x32x96xf32> to vector<32x96xf32>
    %cst = arith.constant dense<0.000000e+00> : vector<8x96xf32>
    %4 = tpu.matmul %1, %3, %cst {dimension_numbers = #tpu.dot_dimension_numbers<[1], [0], [0], [1], [0, 0, 1, 1], [], []>} : vector<8x32xf32>, vector<32x96xf32>, vector<8x96xf32> -> vector<8x96xf32>
    %c0_6 = arith.constant 0 : index
    %c0_7 = arith.constant 0 : index
    %c0_8 = arith.constant 0 : index
    %5 = vector.load %arg4[%c0_6, %c0_7, %c0_8] : memref<1x1x96xf32, #tpu.memory_space<vmem>>, vector<1x1x96xf32>
    %6 = vector.shape_cast %5 : vector<1x1x96xf32> to vector<1x96xf32>
    %7 = vector.broadcast %6 : vector<1x96xf32> to vector<8x96xf32>
    %8 = arith.addf %4, %7 : vector<8x96xf32>
    %cst_9 = arith.constant 0.000000e+00 : f32
    %9 = vector.broadcast %cst_9 : f32 to vector<8x32xf32>
    %10 = vector.extract_strided_slice %8 {offsets = [0, 0], sizes = [8, 8], strides = [1, 1]} : vector<8x96xf32> to vector<8x8xf32>
    %11 = vector.extract_strided_slice %8 {offsets = [0, 32], sizes = [8, 8], strides = [1, 1]} : vector<8x96xf32> to vector<8x8xf32>
    %12 = vector.extract_strided_slice %8 {offsets = [0, 64], sizes = [8, 8], strides = [1, 1]} : vector<8x96xf32> to vector<8x8xf32>
    %cst_10 = arith.constant 0.000000e+00 : f32
    %13 = vector.broadcast %cst_10 : f32 to vector<8x8xf32>
    %cst_11 = arith.constant 0.000000e+00 : f32
    %14 = vector.broadcast %cst_11 : f32 to vector<8x1xf32>
    %cst_12 = arith.constant 0xFF800000 : f32
    %15 = vector.broadcast %cst_12 : f32 to vector<8x1xf32>
    %cst_13 = arith.constant dense<0.000000e+00> : vector<8x8xf32>
    %16 = tpu.matmul %10, %11, %cst_13 {dimension_numbers = #tpu.dot_dimension_numbers<[1], [1], [0], [0], [0, 0, 1, 0], [], []>} : vector<8x8xf32>, vector<8x8xf32>, vector<8x8xf32> -> vector<8x8xf32>
    %cst_14 = arith.constant dense<0xFF800000> : vector<8xf32>
    %17 = vector.multi_reduction <maximumf>, %16, %cst_14 [1] : vector<8x8xf32> to vector<8xf32>
    %18 = vector.shape_cast %17 : vector<8xf32> to vector<8x1xf32>
    %19 = arith.maximumf %15, %18 : vector<8x1xf32>
    %20 = vector.broadcast %19 : vector<8x1xf32> to vector<8x8xf32>
    %21 = arith.subf %16, %20 : vector<8x8xf32>
    %22 = math.exp %21 : vector<8x8xf32>
    %23 = arith.subf %15, %19 : vector<8x1xf32>
    %24 = math.exp %23 : vector<8x1xf32>
    %25 = arith.mulf %24, %14 : vector<8x1xf32>
    %cst_15 = arith.constant dense<0.000000e+00> : vector<8xf32>
    %26 = vector.multi_reduction <add>, %22, %cst_15 [1] : vector<8x8xf32> to vector<8xf32>
    %27 = vector.shape_cast %26 : vector<8xf32> to vector<8x1xf32>
    %28 = arith.addf %25, %27 : vector<8x1xf32>
    %cst_16 = arith.constant dense<0.000000e+00> : vector<8x8xf32>
    %29 = tpu.matmul %22, %12, %cst_16 {dimension_numbers = #tpu.dot_dimension_numbers<[1], [0], [0], [1], [0, 0, 1, 1], [], []>} : vector<8x8xf32>, vector<8x8xf32>, vector<8x8xf32> -> vector<8x8xf32>
    %30 = arith.addf %13, %29 : vector<8x8xf32>
    %31 = vector.broadcast %28 : vector<8x1xf32> to vector<8x8xf32>
    %32 = arith.divf %30, %31 : vector<8x8xf32>
    %c0_17 = arith.constant 0 : index
    %c0_18 = arith.constant 0 : index
    %c0_19 = arith.constant 0 : index
    %33 = vector.load %arg5[%c0_17, %c0_18, %c0_19] : memref<1x32x32xf32, #tpu.memory_space<vmem>>, vector<1x8x32xf32>
    %34 = vector.shape_cast %33 : vector<1x8x32xf32> to vector<8x32xf32>
    %cst_20 = arith.constant dense<0.000000e+00> : vector<8x32xf32>
    %35 = tpu.matmul %32, %34, %cst_20 {dimension_numbers = #tpu.dot_dimension_numbers<[1], [0], [0], [1], [0, 0, 1, 1], [], []>} : vector<8x8xf32>, vector<8x32xf32>, vector<8x32xf32> -> vector<8x32xf32>
    %36 = arith.addf %9, %35 : vector<8x32xf32>
    %37 = vector.extract_strided_slice %8 {offsets = [0, 8], sizes = [8, 8], strides = [1, 1]} : vector<8x96xf32> to vector<8x8xf32>
    %38 = vector.extract_strided_slice %8 {offsets = [0, 40], sizes = [8, 8], strides = [1, 1]} : vector<8x96xf32> to vector<8x8xf32>
    %39 = vector.extract_strided_slice %8 {offsets = [0, 72], sizes = [8, 8], strides = [1, 1]} : vector<8x96xf32> to vector<8x8xf32>
    %cst_21 = arith.constant 0.000000e+00 : f32
    %40 = vector.broadcast %cst_21 : f32 to vector<8x8xf32>
    %cst_22 = arith.constant 0.000000e+00 : f32
    %41 = vector.broadcast %cst_22 : f32 to vector<8x1xf32>
    %cst_23 = arith.constant 0xFF800000 : f32
    %42 = vector.broadcast %cst_23 : f32 to vector<8x1xf32>
    %cst_24 = arith.constant dense<0.000000e+00> : vector<8x8xf32>
    %43 = tpu.matmul %37, %38, %cst_24 {dimension_numbers = #tpu.dot_dimension_numbers<[1], [1], [0], [0], [0, 0, 1, 0], [], []>} : vector<8x8xf32>, vector<8x8xf32>, vector<8x8xf32> -> vector<8x8xf32>
    %cst_25 = arith.constant dense<0xFF800000> : vector<8xf32>
    %44 = vector.multi_reduction <maximumf>, %43, %cst_25 [1] : vector<8x8xf32> to vector<8xf32>
    %45 = vector.shape_cast %44 : vector<8xf32> to vector<8x1xf32>
    %46 = arith.maximumf %42, %45 : vector<8x1xf32>
    %47 = vector.broadcast %46 : vector<8x1xf32> to vector<8x8xf32>
    %48 = arith.subf %43, %47 : vector<8x8xf32>
    %49 = math.exp %48 : vector<8x8xf32>
    %50 = arith.subf %42, %46 : vector<8x1xf32>
    %51 = math.exp %50 : vector<8x1xf32>
    %52 = arith.mulf %51, %41 : vector<8x1xf32>
    %cst_26 = arith.constant dense<0.000000e+00> : vector<8xf32>
    %53 = vector.multi_reduction <add>, %49, %cst_26 [1] : vector<8x8xf32> to vector<8xf32>
    %54 = vector.shape_cast %53 : vector<8xf32> to vector<8x1xf32>
    %55 = arith.addf %52, %54 : vector<8x1xf32>
    %cst_27 = arith.constant dense<0.000000e+00> : vector<8x8xf32>
    %56 = tpu.matmul %49, %39, %cst_27 {dimension_numbers = #tpu.dot_dimension_numbers<[1], [0], [0], [1], [0, 0, 1, 1], [], []>} : vector<8x8xf32>, vector<8x8xf32>, vector<8x8xf32> -> vector<8x8xf32>
    %57 = arith.addf %40, %56 : vector<8x8xf32>
    %58 = vector.broadcast %55 : vector<8x1xf32> to vector<8x8xf32>
    %59 = arith.divf %57, %58 : vector<8x8xf32>
    %c0_28 = arith.constant 0 : index
    %c8 = arith.constant 8 : index
    %c0_29 = arith.constant 0 : index
    %60 = vector.load %arg5[%c0_28, %c8, %c0_29] : memref<1x32x32xf32, #tpu.memory_space<vmem>>, vector<1x8x32xf32>
    %61 = vector.shape_cast %60 : vector<1x8x32xf32> to vector<8x32xf32>
    %cst_30 = arith.constant dense<0.000000e+00> : vector<8x32xf32>
    %62 = tpu.matmul %59, %61, %cst_30 {dimension_numbers = #tpu.dot_dimension_numbers<[1], [0], [0], [1], [0, 0, 1, 1], [], []>} : vector<8x8xf32>, vector<8x32xf32>, vector<8x32xf32> -> vector<8x32xf32>
    %63 = arith.addf %36, %62 : vector<8x32xf32>
    %64 = vector.extract_strided_slice %8 {offsets = [0, 16], sizes = [8, 8], strides = [1, 1]} : vector<8x96xf32> to vector<8x8xf32>
    %65 = vector.extract_strided_slice %8 {offsets = [0, 48], sizes = [8, 8], strides = [1, 1]} : vector<8x96xf32> to vector<8x8xf32>
    %66 = vector.extract_strided_slice %8 {offsets = [0, 80], sizes = [8, 8], strides = [1, 1]} : vector<8x96xf32> to vector<8x8xf32>
    %cst_31 = arith.constant 0.000000e+00 : f32
    %67 = vector.broadcast %cst_31 : f32 to vector<8x8xf32>
    %cst_32 = arith.constant 0.000000e+00 : f32
    %68 = vector.broadcast %cst_32 : f32 to vector<8x1xf32>
    %cst_33 = arith.constant 0xFF800000 : f32
    %69 = vector.broadcast %cst_33 : f32 to vector<8x1xf32>
    %cst_34 = arith.constant dense<0.000000e+00> : vector<8x8xf32>
    %70 = tpu.matmul %64, %65, %cst_34 {dimension_numbers = #tpu.dot_dimension_numbers<[1], [1], [0], [0], [0, 0, 1, 0], [], []>} : vector<8x8xf32>, vector<8x8xf32>, vector<8x8xf32> -> vector<8x8xf32>
    %cst_35 = arith.constant dense<0xFF800000> : vector<8xf32>
    %71 = vector.multi_reduction <maximumf>, %70, %cst_35 [1] : vector<8x8xf32> to vector<8xf32>
    %72 = vector.shape_cast %71 : vector<8xf32> to vector<8x1xf32>
    %73 = arith.maximumf %69, %72 : vector<8x1xf32>
    %74 = vector.broadcast %73 : vector<8x1xf32> to vector<8x8xf32>
    %75 = arith.subf %70, %74 : vector<8x8xf32>
    %76 = math.exp %75 : vector<8x8xf32>
    %77 = arith.subf %69, %73 : vector<8x1xf32>
    %78 = math.exp %77 : vector<8x1xf32>
    %79 = arith.mulf %78, %68 : vector<8x1xf32>
    %cst_36 = arith.constant dense<0.000000e+00> : vector<8xf32>
    %80 = vector.multi_reduction <add>, %76, %cst_36 [1] : vector<8x8xf32> to vector<8xf32>
    %81 = vector.shape_cast %80 : vector<8xf32> to vector<8x1xf32>
    %82 = arith.addf %79, %81 : vector<8x1xf32>
    %cst_37 = arith.constant dense<0.000000e+00> : vector<8x8xf32>
    %83 = tpu.matmul %76, %66, %cst_37 {dimension_numbers = #tpu.dot_dimension_numbers<[1], [0], [0], [1], [0, 0, 1, 1], [], []>} : vector<8x8xf32>, vector<8x8xf32>, vector<8x8xf32> -> vector<8x8xf32>
    %84 = arith.addf %67, %83 : vector<8x8xf32>
    %85 = vector.broadcast %82 : vector<8x1xf32> to vector<8x8xf32>
    %86 = arith.divf %84, %85 : vector<8x8xf32>
    %c0_38 = arith.constant 0 : index
    %c16 = arith.constant 16 : index
    %c0_39 = arith.constant 0 : index
    %87 = vector.load %arg5[%c0_38, %c16, %c0_39] : memref<1x32x32xf32, #tpu.memory_space<vmem>>, vector<1x8x32xf32>
    %88 = vector.shape_cast %87 : vector<1x8x32xf32> to vector<8x32xf32>
    %cst_40 = arith.constant dense<0.000000e+00> : vector<8x32xf32>
    %89 = tpu.matmul %86, %88, %cst_40 {dimension_numbers = #tpu.dot_dimension_numbers<[1], [0], [0], [1], [0, 0, 1, 1], [], []>} : vector<8x8xf32>, vector<8x32xf32>, vector<8x32xf32> -> vector<8x32xf32>
    %90 = arith.addf %63, %89 : vector<8x32xf32>
    %91 = vector.extract_strided_slice %8 {offsets = [0, 24], sizes = [8, 8], strides = [1, 1]} : vector<8x96xf32> to vector<8x8xf32>
    %92 = vector.extract_strided_slice %8 {offsets = [0, 56], sizes = [8, 8], strides = [1, 1]} : vector<8x96xf32> to vector<8x8xf32>
    %93 = vector.extract_strided_slice %8 {offsets = [0, 88], sizes = [8, 8], strides = [1, 1]} : vector<8x96xf32> to vector<8x8xf32>
    %cst_41 = arith.constant 0.000000e+00 : f32
    %94 = vector.broadcast %cst_41 : f32 to vector<8x8xf32>
    %cst_42 = arith.constant 0.000000e+00 : f32
    %95 = vector.broadcast %cst_42 : f32 to vector<8x1xf32>
    %cst_43 = arith.constant 0xFF800000 : f32
    %96 = vector.broadcast %cst_43 : f32 to vector<8x1xf32>
    %cst_44 = arith.constant dense<0.000000e+00> : vector<8x8xf32>
    %97 = tpu.matmul %91, %92, %cst_44 {dimension_numbers = #tpu.dot_dimension_numbers<[1], [1], [0], [0], [0, 0, 1, 0], [], []>} : vector<8x8xf32>, vector<8x8xf32>, vector<8x8xf32> -> vector<8x8xf32>
    %cst_45 = arith.constant dense<0xFF800000> : vector<8xf32>
    %98 = vector.multi_reduction <maximumf>, %97, %cst_45 [1] : vector<8x8xf32> to vector<8xf32>
    %99 = vector.shape_cast %98 : vector<8xf32> to vector<8x1xf32>
    %100 = arith.maximumf %96, %99 : vector<8x1xf32>
    %101 = vector.broadcast %100 : vector<8x1xf32> to vector<8x8xf32>
    %102 = arith.subf %97, %101 : vector<8x8xf32>
    %103 = math.exp %102 : vector<8x8xf32>
    %104 = arith.subf %96, %100 : vector<8x1xf32>
    %105 = math.exp %104 : vector<8x1xf32>
    %106 = arith.mulf %105, %95 : vector<8x1xf32>
    %cst_46 = arith.constant dense<0.000000e+00> : vector<8xf32>
    %107 = vector.multi_reduction <add>, %103, %cst_46 [1] : vector<8x8xf32> to vector<8xf32>
    %108 = vector.shape_cast %107 : vector<8xf32> to vector<8x1xf32>
    %109 = arith.addf %106, %108 : vector<8x1xf32>
    %cst_47 = arith.constant dense<0.000000e+00> : vector<8x8xf32>
    %110 = tpu.matmul %103, %93, %cst_47 {dimension_numbers = #tpu.dot_dimension_numbers<[1], [0], [0], [1], [0, 0, 1, 1], [], []>} : vector<8x8xf32>, vector<8x8xf32>, vector<8x8xf32> -> vector<8x8xf32>
    %111 = arith.addf %94, %110 : vector<8x8xf32>
    %112 = vector.broadcast %109 : vector<8x1xf32> to vector<8x8xf32>
    %113 = arith.divf %111, %112 : vector<8x8xf32>
    %c0_48 = arith.constant 0 : index
    %c24 = arith.constant 24 : index
    %c0_49 = arith.constant 0 : index
    %114 = vector.load %arg5[%c0_48, %c24, %c0_49] : memref<1x32x32xf32, #tpu.memory_space<vmem>>, vector<1x8x32xf32>
    %115 = vector.shape_cast %114 : vector<1x8x32xf32> to vector<8x32xf32>
    %cst_50 = arith.constant dense<0.000000e+00> : vector<8x32xf32>
    %116 = tpu.matmul %113, %115, %cst_50 {dimension_numbers = #tpu.dot_dimension_numbers<[1], [0], [0], [1], [0, 0, 1, 1], [], []>} : vector<8x8xf32>, vector<8x32xf32>, vector<8x32xf32> -> vector<8x32xf32>
    %117 = arith.addf %90, %116 : vector<8x32xf32>
    %c0_51 = arith.constant 0 : index
    %c0_52 = arith.constant 0 : index
    %c0_53 = arith.constant 0 : index
    %118 = vector.load %arg6[%c0_51, %c0_52, %c0_53] : memref<1x1x32xf32, #tpu.memory_space<vmem>>, vector<1x1x32xf32>
    %119 = vector.shape_cast %118 : vector<1x1x32xf32> to vector<1x32xf32>
    %120 = vector.broadcast %119 : vector<1x32xf32> to vector<8x32xf32>
    %121 = arith.addf %117, %120 : vector<8x32xf32>
    %cst_54 = arith.constant dense<0.000000e+00> : vector<8xf32>
    %122 = vector.multi_reduction <add>, %121, %cst_54 [1] : vector<8x32xf32> to vector<8xf32>
    %123 = vector.shape_cast %122 : vector<8xf32> to vector<8x1xf32>
    %cst_55 = arith.constant 3.200000e+01 : f32
    %124 = vector.broadcast %cst_55 : f32 to vector<8x1xf32>
    %125 = arith.divf %123, %124 : vector<8x1xf32>
    %126 = vector.broadcast %125 : vector<8x1xf32> to vector<8x32xf32>
    %127 = arith.subf %121, %126 : vector<8x32xf32>
    %128 = arith.mulf %127, %127 : vector<8x32xf32>
    %cst_56 = arith.constant dense<0.000000e+00> : vector<8xf32>
    %129 = vector.multi_reduction <add>, %128, %cst_56 [1] : vector<8x32xf32> to vector<8xf32>
    %130 = vector.shape_cast %129 : vector<8xf32> to vector<8x1xf32>
    %cst_57 = arith.constant 3.200000e+01 : f32
    %131 = vector.broadcast %cst_57 : f32 to vector<8x1xf32>
    %132 = arith.divf %130, %131 : vector<8x1xf32>
    %133 = vector.broadcast %125 : vector<8x1xf32> to vector<8x32xf32>
    %134 = arith.subf %121, %133 : vector<8x32xf32>
    %cst_58 = arith.constant 9.99999974E-6 : f32
    %135 = vector.broadcast %cst_58 : f32 to vector<8x1xf32>
    %136 = arith.addf %132, %135 : vector<8x1xf32>
    %137 = math.rsqrt %136 : vector<8x1xf32>
    %138 = vector.broadcast %137 : vector<8x1xf32> to vector<8x32xf32>
    %139 = arith.mulf %134, %138 : vector<8x32xf32>
    %c0_59 = arith.constant 0 : index
    %c0_60 = arith.constant 0 : index
    %c0_61 = arith.constant 0 : index
    %140 = vector.load %arg7[%c0_59, %c0_60, %c0_61] : memref<1x1x32xf32, #tpu.memory_space<vmem>>, vector<1x1x32xf32>
    %141 = vector.shape_cast %140 : vector<1x1x32xf32> to vector<1x32xf32>
    %142 = vector.broadcast %141 : vector<1x32xf32> to vector<8x32xf32>
    %143 = arith.mulf %139, %142 : vector<8x32xf32>
    %c0_62 = arith.constant 0 : index
    %c0_63 = arith.constant 0 : index
    %c0_64 = arith.constant 0 : index
    %144 = vector.load %arg8[%c0_62, %c0_63, %c0_64] : memref<1x1x32xf32, #tpu.memory_space<vmem>>, vector<1x1x32xf32>
    %145 = vector.shape_cast %144 : vector<1x1x32xf32> to vector<1x32xf32>
    %146 = vector.broadcast %145 : vector<1x32xf32> to vector<8x32xf32>
    %147 = arith.addf %143, %146 : vector<8x32xf32>
    %c0_65 = arith.constant 0 : index
    %c0_66 = arith.constant 0 : index
    %c0_67 = arith.constant 0 : index
    %148 = vector.load %arg9[%c0_65, %c0_66, %c0_67] : memref<1x32x128xf32, #tpu.memory_space<vmem>>, vector<1x32x128xf32>
    %149 = vector.shape_cast %148 : vector<1x32x128xf32> to vector<32x128xf32>
    %cst_68 = arith.constant dense<0.000000e+00> : vector<8x128xf32>
    %150 = tpu.matmul %147, %149, %cst_68 {dimension_numbers = #tpu.dot_dimension_numbers<[1], [0], [0], [1], [0, 0, 1, 1], [], []>} : vector<8x32xf32>, vector<32x128xf32>, vector<8x128xf32> -> vector<8x128xf32>
    %c0_69 = arith.constant 0 : index
    %c0_70 = arith.constant 0 : index
    %c0_71 = arith.constant 0 : index
    %151 = vector.load %arg10[%c0_69, %c0_70, %c0_71] : memref<1x1x128xf32, #tpu.memory_space<vmem>>, vector<1x1x128xf32>
    %152 = vector.shape_cast %151 : vector<1x1x128xf32> to vector<1x128xf32>
    %153 = vector.broadcast %152 : vector<1x128xf32> to vector<8x128xf32>
    %154 = arith.addf %150, %153 : vector<8x128xf32>
    %cst_72 = arith.constant 5.000000e-01 : f32
    %155 = vector.broadcast %cst_72 : f32 to vector<8x128xf32>
    %156 = arith.mulf %155, %154 : vector<8x128xf32>
    %157 = arith.mulf %154, %154 : vector<8x128xf32>
    %158 = arith.mulf %157, %154 : vector<8x128xf32>
    %cst_73 = arith.constant 4.471500e-02 : f32
    %159 = vector.broadcast %cst_73 : f32 to vector<8x128xf32>
    %160 = arith.mulf %159, %158 : vector<8x128xf32>
    %161 = arith.addf %154, %160 : vector<8x128xf32>
    %cst_74 = arith.constant 0.797884583 : f32
    %162 = vector.broadcast %cst_74 : f32 to vector<8x128xf32>
    %163 = arith.mulf %162, %161 : vector<8x128xf32>
    %164 = math.tanh %163 : vector<8x128xf32>
    %cst_75 = arith.constant 1.000000e+00 : f32
    %165 = vector.broadcast %cst_75 : f32 to vector<8x128xf32>
    %166 = arith.addf %165, %164 : vector<8x128xf32>
    %167 = arith.mulf %156, %166 : vector<8x128xf32>
    %c0_76 = arith.constant 0 : index
    %c0_77 = arith.constant 0 : index
    %c0_78 = arith.constant 0 : index
    %168 = vector.load %arg11[%c0_76, %c0_77, %c0_78] : memref<1x128x32xf32, #tpu.memory_space<vmem>>, vector<1x128x32xf32>
    %169 = vector.shape_cast %168 : vector<1x128x32xf32> to vector<128x32xf32>
    %cst_79 = arith.constant dense<0.000000e+00> : vector<8x32xf32>
    %170 = tpu.matmul %167, %169, %cst_79 {dimension_numbers = #tpu.dot_dimension_numbers<[1], [0], [0], [1], [0, 0, 1, 1], [], []>} : vector<8x128xf32>, vector<128x32xf32>, vector<8x32xf32> -> vector<8x32xf32>
    %c0_80 = arith.constant 0 : index
    %c0_81 = arith.constant 0 : index
    %c0_82 = arith.constant 0 : index
    %171 = vector.load %arg12[%c0_80, %c0_81, %c0_82] : memref<1x1x32xf32, #tpu.memory_space<vmem>>, vector<1x1x32xf32>
    %172 = vector.shape_cast %171 : vector<1x1x32xf32> to vector<1x32xf32>
    %173 = vector.broadcast %172 : vector<1x32xf32> to vector<8x32xf32>
    %174 = arith.addf %170, %173 : vector<8x32xf32>
    %c0_83 = arith.constant 0 : index
    %c0_84 = arith.constant 0 : index
    %c0_85 = arith.constant 0 : index
    %c0_86 = arith.constant 0 : index
    %175 = vector.load %arg13[%c0_83, %c0_84, %c0_85, %c0_86] : memref<1x1x8x32xf32, #tpu.memory_space<vmem>>, vector<1x1x8x32xf32>
    %176 = vector.shape_cast %175 : vector<1x1x8x32xf32> to vector<8x32xf32>
    %177 = vector.shape_cast %174 : vector<8x32xf32> to vector<1x1x8x32xf32>
    tpu.vector_store %arg13[%c0_83, %c0_84, %c0_85, %c0_86], %177 {strides = array<i32>} : memref<1x1x8x32xf32, #tpu.memory_space<vmem>>, vector<1x1x8x32xf32>,
    return
  }
  func.func @transform_0(%arg0: i32, %arg1: i32) -> (i32, i32, i32, i32) {
    %c0_i32 = arith.constant 0 : i32
    %c0_i32_0 = arith.constant 0 : i32
    %c0_i32_1 = arith.constant 0 : i32
    %c0_i32_2 = arith.constant 0 : i32
    return %c0_i32, %arg1, %c0_i32_0, %c0_i32_1 : i32, i32, i32, i32
  }
  func.func @transform_1(%arg0: i32, %arg1: i32) -> (i32, i32, i32) {
    %c0_i32 = arith.constant 0 : i32
    %c0_i32_0 = arith.constant 0 : i32
    %c0_i32_1 = arith.constant 0 : i32
    return %arg0, %c0_i32, %c0_i32_0 : i32, i32, i32
  }
  func.func @transform_2(%arg0: i32, %arg1: i32) -> (i32, i32, i32) {
    %c0_i32 = arith.constant 0 : i32
    %c0_i32_0 = arith.constant 0 : i32
    %c0_i32_1 = arith.constant 0 : i32
    return %arg0, %c0_i32, %c0_i32_0 : i32, i32, i32
  }
  func.func @transform_3(%arg0: i32, %arg1: i32) -> (i32, i32, i32) {
    %c0_i32 = arith.constant 0 : i32
    %c0_i32_0 = arith.constant 0 : i32
    %c0_i32_1 = arith.constant 0 : i32
    return %arg0, %c0_i32, %c0_i32_0 : i32, i32, i32
  }
  func.func @transform_4(%arg0: i32, %arg1: i32) -> (i32, i32, i32) {
    %c0_i32 = arith.constant 0 : i32
    %c0_i32_0 = arith.constant 0 : i32
    %c0_i32_1 = arith.constant 0 : i32
    return %arg0, %c0_i32, %c0_i32_0 : i32, i32, i32
  }
  func.func @transform_5(%arg0: i32, %arg1: i32) -> (i32, i32, i32) {
    %c0_i32 = arith.constant 0 : i32
    %c0_i32_0 = arith.constant 0 : i32
    %c0_i32_1 = arith.constant 0 : i32
    return %arg0, %c0_i32, %c0_i32_0 : i32, i32, i32
  }
  func.func @transform_6(%arg0: i32, %arg1: i32) -> (i32, i32, i32) {
    %c0_i32 = arith.constant 0 : i32
    %c0_i32_0 = arith.constant 0 : i32
    %c0_i32_1 = arith.constant 0 : i32
    return %arg0, %c0_i32, %c0_i32_0 : i32, i32, i32
  }
  func.func @transform_7(%arg0: i32, %arg1: i32) -> (i32, i32, i32) {
    %c0_i32 = arith.constant 0 : i32
    %c0_i32_0 = arith.constant 0 : i32
    %c0_i32_1 = arith.constant 0 : i32
    return %arg0, %c0_i32, %c0_i32_0 : i32, i32, i32
  }
  func.func @transform_8(%arg0: i32, %arg1: i32) -> (i32, i32, i32) {
    %c0_i32 = arith.constant 0 : i32
    %c0_i32_0 = arith.constant 0 : i32
    %c0_i32_1 = arith.constant 0 : i32
    return %arg0, %c0_i32, %c0_i32_0 : i32, i32, i32
  }
  func.func @transform_9(%arg0: i32, %arg1: i32) -> (i32, i32, i32) {
    %c0_i32 = arith.constant 0 : i32
    %c0_i32_0 = arith.constant 0 : i32
    %c0_i32_1 = arith.constant 0 : i32
    return %arg0, %c0_i32, %c0_i32_0 : i32, i32, i32
  }
  func.func @transform_10(%arg0: i32, %arg1: i32) -> (i32, i32, i32) {
    %c0_i32 = arith.constant 0 : i32
    %c0_i32_0 = arith.constant 0 : i32
    %c0_i32_1 = arith.constant 0 : i32
    return %arg0, %c0_i32, %c0_i32_0 : i32, i32, i32
  }
  func.func @transform_11(%arg0: i32, %arg1: i32) -> (i32, i32, i32, i32) {
    %c0_i32 = arith.constant 0 : i32
    %c0_i32_0 = arith.constant 0 : i32
    %c0_i32_1 = arith.constant 0 : i32
    return %arg0, %arg1, %c0_i32, %c0_i32_0 : i32, i32, i32, i32
  }
}

</mosaic_0001>

<bundles_post_ra>
// kernel: moe_forward.3
= control target key start
LH: loop header
LB: loop body
LE: loop exit
PB: predicated region body
PF: predicated region fallthrough
CT: control target
= control target key end

     0   :  { %s283_s0 = inlined_call_operand.vmem [shape: f32[16,32], index: 0, kind: input, shape index: {}]   ;;  %s284_s1 = inlined_call_operand.vmem [shape: f32[32,2], index: 1, kind: input, shape index: {}]   ;;  %s285_s2 = inlined_call_operand.vmem [shape: f32[1,2], index: 2, kind: input, shape index: {}]   ;;  %s286_s3 = inlined_call_operand.vmem [shape: f32[2,16,32], index: 3, kind: input, shape index: {}]   ;;  %s287_s4 = inlined_call_operand.hbm [shape: f32[16,32], index: 4, kind: output, shape index: {}]  }
   0x1   :  { %v23_v0 = vld [vmem:[%s284_s1 + $0x18] sm:$0xff]  ;;  %v22_v1 = vld [vmem:[%s284_s1 + $0x10] sm:$0xff]  ;;  %v21_v2 = vld [vmem:[%s284_s1 + $0x8] sm:$0xff] }
   0x2   :  { %47 = vmatpush.msra.mxu0 %v23_v0  ;;  %162 = vmatpush.msra.mxu1 %v23_v0 }
   0x3   :  { %9 = vsyncpa [#allocation3], 0  ;;  %v20_v3 = vld [vmem:[%s284_s1] sm:$0xff]  ;;  %vm28_vm0 = vcmask 261120   ;;  %v19_v5 = vld [vmem:[%s283_s0 + $0x8] sm:$0xff]  ;;  %vm58_vm1 = vcmask 15360  }
   0x4   :  { %48 = vmatpush.msra.mxu0 %v22_v1  ;;  %163 = vmatpush.msra.mxu1 %v22_v1  ;;  %v18_v4 = vld [vmem:[%s283_s0] sm:$0xff]  ;;  %v209_v23 = vmov 1   ;;  %v210_v24 = vmov 0   ;;  %v160_v51 = vld [vmem:[%s286_s3 + $0x10] sm:$0xff]  ;;  %v108_v56 = vld [vmem:[%s286_s3 + $0x8] sm:$0xff]  ;;  %s211_s8 = smov [#allocation2]  }
   0x5   :  { %v174_v6 = vld [vmem:[%s285_s2] ss:$0 sm:$0xff]  ;;  %172 = vset.pattern.permute.xlu0 %v209_v23  ;;  %171 = vset.pattern.permute.xlu2 %v210_v24  ;;  %v161_v58 = vld [vmem:[%s286_s3 + $0x18] sm:$0xff]  ;;  %s144_s9 = sshll.u32 %s211_s8, 4  ;;  %s146_s12 = sshll.u32 %s287_s4, 4  ;;  %s145_s9 = int_to_ptr.vmem [resolvable:$true] %s144_s9  ;;  %s147_s12 = int_to_ptr.hbm [resolvable:$true] %s146_s12 }
   0x6   :  { %49 = vmatpush.msra.mxu0 %v21_v2  ;;  %164 = vmatpush.msra.mxu1 %v21_v2  ;;  %v107_v50 = vld [vmem:[%s286_s3] sm:$0xff]  ;;  %s212_s13 = smov 128   ;;  %s213_s14 = smov 8  }
   0x7   :  { %173 = vset.pattern.permute.xlu1 %v209_v23 }
   0x8   :  { %50 = vmatpush.msra.mxu0 %v20_v3  ;;  %165 = vmatpush.msra.mxu1 %v20_v3 }
   0x9   :  { %158 = vmatmul.msk.f32.vlgmr.msra.gmra.mxu0 %vm28_vm0, %v18_v4  ;;  %159 = vmatmul.msk.f32.vlgmr.msra.gmra.mxu1 %vm28_vm0, %v19_v5 }
  0x86   :  { %v52_v7 = vpop.f32.mrf.mxu0  ;;  %v55_v9 = vpop.f32.mrf.mxu1 }
  0x87   :  { %v53_v8 = vadd.f32 %v174_v6, %v52_v7  ;;  %v56_v11 = vadd.f32 %v174_v6, %v55_v9 }
  0x89   :  { %v59_v10 = vsel %vm58_vm1, %v53_v8, -inf  ;;  %v62_v12 = vsel %vm58_vm1, %v56_v11, -inf }
  0x8a   :  { %60 = vmax.xlane.f32.xlu0 %v59_v10 }
  0x92   :  { %63 = vmax.xlane.f32.xlu0 %v62_v12 }
  0xfd   :  { %v61_v13 = vpop.xlane.xlu0 %60 }
  0xfe   :  { %v65_v14 = vsub.f32 %v53_v8, %v61_v13 }
 0x100   :  { %v67_v15 = vmul.f32 1.442695, %v65_v14 }
 0x102   :  { %175 = vpow2.f32 %v67_v15 }
 0x105   :  { %v64_v16 = vpop.xlane.xlu0 %63 }
 0x106   :  { %v66_v17 = vsub.f32 %v56_v11, %v64_v16 }
 0x108   :  { %v176_v18 = vpop.eup %175  ;;  %v69_v19 = vmul.f32 1.442695, %v66_v17 }
 0x109   :  { %v71_v20 = vsel %vm58_vm1, %v176_v18, 0.0 }
 0x10a   :  { %177 = vpow2.f32 %v69_v19  ;;  %72 = vadd.xlane.f32.xlu1 %v71_v20 }
 0x110   :  { %v178_v21 = vpop.eup %177 }
 0x111   :  { %v74_v22 = vsel %vm58_vm1, %v178_v21, 0.0 }
 0x112   :  { %75 = vadd.xlane.f32.xlu1 %v74_v22 }
 0x17d   :  { %v73_v25 = vpop.xlane.xlu1 %72 }
 0x17e   :  { %179 = vrcp.f32 %v73_v25  ;;  %v88_v30 = vand.u32 2147483648, %v73_v25  ;;  %v86_v32 = vand.u32 2147483647, %v73_v25  ;;  %vm82_vm3 = vweird.f32 %v73_v25 }
 0x180   :  { %v89_v35 = vor.u32 1.1754944e-38, %v88_v30  ;;  %vm87_vm5 = vcmp.eq.f32.partialorder %v86_v32, 8.507059e+37 }
 0x184   :  { %v180_v26 = vpop.eup %179 }
 0x185   :  { %v78_v27 = vmul.f32 %v180_v26, %v73_v25  ;;  %v76_v28 = vpop.xlane.xlu1 %75  ;;  %vm83_vm2 = vweird.f32 %v180_v26 }
 0x186   :  { %181 = vrcp.f32 %v76_v28  ;;  %vm84_vm4 = vmor %vm82_vm3, %vm83_vm2  ;;  %v103_v41 = vand.u32 2147483648, %v76_v28  ;;  %v101_v43 = vand.u32 2147483647, %v76_v28  ;;  %vm97_vm7 = vweird.f32 %v76_v28 }
 0x187   :  { %v79_v29 = vsub.f32 1.0, %v78_v27 }
 0x188   :  { %v104_v45 = vor.u32 1.1754944e-38, %v103_v41  ;;  %vm102_vm9 = vcmp.eq.f32.partialorder %v101_v43, 8.507059e+37 }
 0x189   :  { %v80_v31 = vmul.f32 %v180_v26, %v79_v29 }
 0x18b   :  { %v81_v33 = vadd.f32 %v180_v26, %v80_v31 }
 0x18c   :  { %v182_v34 = vpop.eup %181 }
 0x18d   :  { %v93_v36 = vmul.f32 %v182_v34, %v76_v28  ;;  %v85_v37 = vsel %vm84_vm4, %v180_v26, %v81_v33  ;;  %vm98_vm6 = vweird.f32 %v182_v34 }
 0x18e   :  { %v90_v38 = vsel %vm87_vm5, %v89_v35, %v85_v37  ;;  %vm99_vm8 = vmor %vm97_vm7, %vm98_vm6 }
 0x18f   :  { %v94_v39 = vsub.f32 1.0, %v93_v36  ;;  %v91_v40 = vmul.f32 %v176_v18, %v90_v38 }
 0x191   :  { %v95_v42 = vmul.f32 %v182_v34, %v94_v39  ;;  %127 = vperm.xlu0 %172, %v91_v40   ;;  %111 = vperm.xlu2 %171, %v91_v40  }
 0x193   :  { %v96_v44 = vadd.f32 %v182_v34, %v95_v42 }
 0x195   :  { %v100_v46 = vsel %vm99_vm8, %v182_v34, %v96_v44 }
 0x196   :  { %v105_v47 = vsel %vm102_vm9, %v104_v45, %v100_v46 }
 0x197   :  { %v106_v48 = vmul.f32 %v178_v21, %v105_v47 }
 0x199   :  { %131 = vperm.xlu1 %173, %v106_v48   ;;  %116 = vperm.xlu2 %171, %v106_v48  }
 0x1eb   :  { %v112_v49 = vpop.permute.xlu2 %111 }
 0x1ec   :  { %v119_v53 = vmul.f32 %v112_v49, %v107_v50 }
 0x1f3   :  { %v117_v57 = vpop.permute.xlu2 %116 }
 0x1f4   :  { %v120_v60 = vmul.f32 %v117_v57, %v108_v56 }
 0x203   :  { %v128_v52 = vpop.permute.xlu0 %127 }
 0x204   :  { %v134_v54 = vmul.f32 %v160_v51, %v128_v52 }
 0x206   :  { %v136_v55 = vadd.f32 %v134_v54, %v119_v53 }
 0x208   :  { %138 = vst.msk [vmem:[#allocation2] sm:$0xff] %vm28_vm0, %v136_v55 }
 0x20b   :  { %v132_v59 = vpop.permute.xlu1 %131 }
 0x20c   :  { %v135_v61 = vmul.f32 %v161_v58, %v132_v59 }
 0x20e   :  { %v137_v62 = vadd.f32 %v135_v61, %v120_v60 }
 0x210   :  { %139 = vst.msk [vmem:[#allocation2 + $0x8] sm:$0xff] %vm28_vm0, %v137_v62 }
 0x211   :  { %152 = dma.vmem_to_hbm [thread:$0]  %s145_s9, 256, %s147_s12, [#allocation3], %s212_s13, %s212_s13, %s213_s14  }
 0x212   :  { %207 = dma.done.wait [#allocation3], 256  }
 0x213   :  { %208 = vsyncadd [#allocation3], 4294967040 }
 0x214   :  { %157 = vsyncpa [#allocation3], 1 }

// kernel: moe_forward.2
= control target key start
LH: loop header
LB: loop body
LE: loop exit
PB: predicated region body
PF: predicated region fallthrough
CT: control target
= control target key end

     0   :  { %s1578_s17 = smov 0   ;;  %s1580_s18 = smov 0   ;;  %s1763_s0 = inlined_call_operand.vmem [shape: f32[1,2,8,32], index: 0, kind: input, shape index: {}]   ;;  %s1764_s1 = inlined_call_operand.vmem [shape: f32[2,32,96], index: 1, kind: input, shape index: {}]   ;;  %s1765_s2 = inlined_call_operand.vmem [shape: f32[2,1,96], index: 2, kind: input, shape index: {}]   ;;  %s1766_s3 = inlined_call_operand.vmem [shape: f32[2,32,32], index: 3, kind: input, shape index: {}]   ;;  %s1767_s4 = inlined_call_operand.vmem [shape: f32[2,1,32], index: 4, kind: input, shape index: {}]   ;;  %s1768_s5 = inlined_call_operand.vmem [shape: f32[2,1,32], index: 5, kind: input, shape index: {}]   ;;  %s1769_s6 = inlined_call_operand.vmem [shape: f32[2,1,32], index: 6, kind: input, shape index: {}]   ;;  %s1770_s7 = inlined_call_operand.vmem [shape: f32[2,32,128], index: 7, kind: input, shape index: {}]   ;;  %s1771_s8 = inlined_call_operand.vmem [shape: f32[2,1,128], index: 8, kind: input, shape index: {}]   ;;  %s1772_s9 = inlined_call_operand.vmem [shape: f32[2,128,32], index: 9, kind: input, shape index: {}]   ;;  %s1773_s10 = inlined_call_operand.vmem [shape: f32[2,1,32], index: 10, kind: input, shape index: {}]   ;;  %s1774_s11 = inlined_call_operand.vmem [shape: f32[2,2,8,32], index: 11, kind: output, shape index: {}]  }
   0x1   :  { %1775 = sst [smem:[#allocation2_spill]] %s1763_s0  ;;  %s1582_s19 = smov 0  }
   0x2   :  { %s1584_s20 = smov 0   ;;  %s1586_s21 = smov 0  }
   0x3 LB: > { %s30_s22 = sadd.s32 1, %s1496_s19  ;;  %s33_s23 = sadd.s32 1, %s1500_s20  ;;  %s1504_s21 = sphi %s1586_s21, %s21_s21   ;;  %s1500_s20 = sphi %s1584_s20, %s1781_s20   ;;  %s1496_s19 = sphi %s1582_s19, %s1780_s19   ;;  %s1492_s18 = sphi %s1580_s18, %s1779_s18   ;;  %s1488_s17 = sphi %s1578_s17, %s1778_s17  }
   0x4   : > { %p31_p0 = scmp.ge.s32.totalorder %s30_s22, 2  ;;  %p1342_p1 = scmp.ge.s32.totalorder %s1504_s21, 1 }
   0x5   : > { %p438_p2 = scmp.lt.s32.totalorder %s1504_s21, 5 }
   0x6   : > { %s1783_s22 = smov (%p31_p0, %s30_s22), 0  ;;  %s1785_s23 = smov (!%p31_p0, %s33_s23), %s1500_s20 }
   0x7   : > { %p439_p3 = pnand %p1342_p1, %p438_p2  ;;  %p35_p4 = scmp.ge.s32.totalorder %s1785_s23, 2 }
   0x8   : > { %p522_p5 = scmp.lt.s32.totalorder (!%p439_p3), %s1492_s18, 1  ;;  %p518_p6 = scmp.lt.s32.totalorder (!%p439_p3), %s1488_s17, 1 }
   0x9   : > { %s1787_s23 = smov (%p35_p4, %s1785_s23), 0  ;;  %442 = sbr.rel (%p439_p3) target bundleno = 1648 (0x670), region = 64 }
   0xa   : > { %s1776_s0 = sld [smem:[#allocation2_spill]] (!%p439_p3)  ;;  %s1506_s16 = smov (!%p439_p3), 112  }
   0xb   : > { %s1507_s25 = smov (!%p439_p3), 120   ;;  %s1508_s26 = smov (!%p439_p3), 96  }
   0xc   : > { %s1509_s29 = smov (!%p439_p3), 56   ;;  %s1512_s30 = smov (!%p439_p3), 64  }
   0xd   : > { %s1514_s13 = smov (!%p439_p3), 48   ;;  %s1515_s14 = smov (!%p439_p3), 40  }
   0xe   : > { %s1789_s18 = smov (!%p522_p5, %s1492_s18), 1  ;;  %s1791_s17 = smov (!%p518_p6, %s1488_s17), 1  ;;  %vm577_vm0 = vcmask 261120   ;;  %vm604_vm1 = vcmask 64512  }
   0xf   : > { %s1613_s24 = sshll.u32 %s1789_s18, 5  ;;  %s1343_s28 = sshll.u32 %s1791_s17, 3 }
  0x10   : > { %s526_s27 = scalar_lea.vmem %s1764_s1, %s1613_s24  ;;  %s529_s12 = scalar_lea.vmem %s1765_s2, %s1789_s18 }
  0x11   : > { %v572_v0 = vld [vmem:[%s526_s27 + $0x18] sm:$0xff]  ;;  %v571_v1 = vld [vmem:[%s526_s27 + $0x10] sm:$0xff]  ;;  %v570_v2 = vld [vmem:[%s526_s27 + $0x8] sm:$0xff]  ;;  %s521_s15 = scalar_lea.vmem %s1776_s0, %s1343_s28  ;;  %s1510_s28 = smov 80  }
  0x12   : > { %593 = vmatpush.msra.mxu0 %v572_v0  ;;  %v569_v3 = vld [vmem:[%s526_s27] sm:$0xff]  ;;  %s1511_s27 = smov 88  }
  0x13   : > { %v568_v4 = vld [vmem:[%s521_s15] sm:$0xff]  ;;  %s1516_s15 = smov 72  }
  0x14   : > { %594 = vmatpush.msra.mxu0 %v571_v1  ;;  %v1430_v5 = vld [vmem:[%s529_s12] ss:$0 sm:$0xff]  ;;  %s1513_s12 = smov 104  }
  0x16   : > { %595 = vmatpush.msra.mxu0 %v570_v2 }
  0x18   : > { %596 = vmatpush.msra.mxu0 %v569_v3 }
  0x19   : > { %1354 = vmatmul.msk.f32.vlgmr.msra.gmra.mxu0 %vm577_vm0, %v568_v4 }
  0x96   : > { %v598_v6 = vpop.f32.mrf.mxu0 }
  0x97   : > { %v599_v7 = vadd.f32 %v1430_v5, %v598_v6 }
  0x99   : > { %815 = vrot.lane.b32.xlu2 %v599_v7, %s1506_s16  ;;  %685 = vrot.lane.b32.xlu1 %v599_v7, %s1507_s25  ;;  %s543_s16 = scalar_lea.vmem %s1769_s6, %s1789_s18 }
  0x9a   : > { %602 = vrot.lane.b32.xlu0 %v599_v7, %s1508_s26  ;;  %s1654_s26 = scalar_lea.vmem %s1766_s3, %s1613_s24 }
  0x9b   : > { %v684_v41 = vld [vmem:[%s1654_s26] sm:$0xff]  ;;  %v768_v45 = vld [vmem:[%s1654_s26 + $0x8] sm:$0xff] }
  0x9c   : > { %810 = vmatpush.msra.mxu3 %v684_v41 }
  0xa1   : > { %727 = vrot.lane.b32.xlu2 %v599_v7, %s1509_s29  ;;  %817 = vrot.lane.b32.xlu1 %v599_v7, %s1510_s28  ;;  %s551_s29 = scalar_lea.vmem %s1771_s8, %s1789_s18 }
  0xa2   : > { %687 = vrot.lane.b32.xlu0 %v599_v7, %s1511_s27  ;;  %s537_s27 = scalar_lea.vmem %s1767_s4, %s1789_s18 }
  0xa9   : > { %643 = vrot.lane.b32.xlu1 %v599_v7, %s1512_s30  ;;  %s548_s30 = scalar_lea.vmem %s1770_s7, %s1613_s24 }
  0xf3   : > { %v816_v10 = vpop.permute.xlu2 %815 }
  0xfb   : > { %v728_v14 = vpop.permute.xlu2 %727 }
 0x10b   : > { %v686_v8 = vpop.permute.xlu1 %685 }
 0x10c   : > { %v603_v9 = vpop.permute.xlu0 %602 }
 0x10d   : > { %1355 = vmatpush.xpose.msk.msra.mxu1 %vm604_vm1, %v603_v9 }
 0x110   : > { %1356 = vmatmul.msk.f32.vlgmr.msra.gmra.mxu1 %vm604_vm1, %v599_v7 }
 0x111   : > { %787 = vmatpush.msrb.mxu1 %v768_v45 }
 0x113   : > { %v818_v11 = vpop.permute.xlu1 %817 }
 0x114   : > { %v688_v12 = vpop.permute.xlu0 %687 }
 0x115   : > { %1358 = vmatpush.xpose.msk.msrb.mxu0 %vm604_vm1, %v688_v12 }
 0x118   : > { %1359 = vmatmul.msk.f32.vlgmr.msrb.gmra.mxu0 %vm604_vm1, %v686_v8 }
 0x119   : > { %1363 = vmatpush.xpose.msk.msra.mxu0 %vm604_vm1, %v818_v11 }
 0x11b   : > { %v644_v13 = vpop.permute.xlu1 %643 }
 0x11c   : > { %664 = vmatpush.msra.mxu2 %v644_v13 }
 0x11e   : > { %748 = vmatpush.msrb.mxu2 %v728_v14 }
 0x120   : > { %1364 = vmatmul.msk.f32.vlgmr.msra.gmra.mxu0 %vm604_vm1, %v816_v10 }
 0x18d   : > { %v626_v15 = vpop.f32.mrf.mxu1 }
 0x18e   : > { %v629_v16 = vsel %vm604_vm1, %v626_v15, -inf }
 0x18f   : > { %630 = vmax.xlane.f32.xlu2 %v629_v16 }
 0x195   : > { %v710_v17 = vpop.f32.mrf.mxu0 }
 0x196   : > { %v713_v18 = vsel %vm604_vm1, %v710_v17, -inf }
 0x197   : > { %714 = vmax.xlane.f32.xlu0 %v713_v18 }
 0x19d   : > { %v840_v19 = vpop.f32.mrf.mxu0 }
 0x19e   : > { %v843_v20 = vsel %vm604_vm1, %v840_v19, -inf }
 0x19f   : > { %844 = vmax.xlane.f32.xlu1 %v843_v20 }
 0x1a7   : > { %923 = vrot.lane.b32.xlu2 %v599_v7, %s1513_s12  ;;  %s1377_s12 = sshll.u32 %s1789_s18, 7 }
 0x1ab   : > { %857 = vrot.lane.b32.xlu0 %v599_v7, %s1514_s13  ;;  %s1777_s13 = scalar_lea.vmem %s1768_s5, %s1789_s18 }
 0x1af   : > { %965 = vrot.lane.b32.xlu2 %v599_v7, %s1515_s14  ;;  %s1699_s14 = scalar_lea.vmem %s1772_s9, %s1377_s12  ;;  %s1352_s12 = sshll.u32 %s1789_s18, 1 }
 0x1b8   : > { %925 = vrot.lane.b32.xlu1 %v599_v7, %s1516_s15 }
 0x202   : > { %v631_v21 = vpop.xlane.xlu2 %630 }
 0x203   : > { %v632_v22 = vsub.f32 %v626_v15, %v631_v21  ;;  %v635_v39 = vsub.f32 -inf, %v631_v21 }
 0x205   : > { %v633_v23 = vmul.f32 1.442695, %v632_v22  ;;  %v636_v40 = vmul.f32 1.442695, %v635_v39 }
 0x207   : > { %1436 = vpow2.f32 %v633_v23 }
 0x20a   : > { %v924_v24 = vpop.permute.xlu2 %923  ;;  %v715_v25 = vpop.xlane.xlu0 %714 }
 0x20b   : > { %v716_v26 = vsub.f32 %v710_v17, %v715_v25  ;;  %v719_v42 = vsub.f32 -inf, %v715_v25 }
 0x20d   : > { %v1437_v27 = vpop.eup %1436  ;;  %v717_v28 = vmul.f32 1.442695, %v716_v26  ;;  %v720_v43 = vmul.f32 1.442695, %v719_v42  ;;  %v898_v26 = vld [vmem:[%s1654_s26 + $0x10] sm:$0xff] }
 0x20e   : > { %1357 = vmatmul.msk.f32.vlgmr.msra.gmra.mxu2 %vm604_vm1, %v1437_v27  ;;  %v639_v29 = vsel %vm604_vm1, %v1437_v27, 0.0  ;;  %917 = vmatpush.msra.mxu1 %v898_v26  ;;  %v1127_v26 = vld [vmem:[%s1699_s14 + $0x60] sm:$0xff] }
 0x20f   : > { %1438 = vpow2.f32 %v717_v28  ;;  %640 = vadd.xlane.f32.xlu2 %v639_v29 }
 0x212   : > { %v966_v30 = vpop.permute.xlu2 %965  ;;  %v1639_v31 = vpop.xlane.xlu1 %844 }
 0x213   : > { %v846_v32 = vsub.f32 %v840_v19, %v1639_v31  ;;  %986 = vmatpush.msrb.mxu0 %v966_v30  ;;  %v849_v25 = vsub.f32 -inf, %v1639_v31 }
 0x215   : > { %v1439_v33 = vpop.eup %1438  ;;  %v847_v34 = vmul.f32 1.442695, %v846_v32  ;;  %v850_v27 = vmul.f32 1.442695, %v849_v25 }
 0x216   : > { %1360 = vmatmul.msk.f32.vlgmr.msrb.gmra.mxu2 %vm604_vm1, %v1439_v33  ;;  %v723_v35 = vsel %vm604_vm1, %v1439_v33, 0.0 }
 0x217   : > { %1440 = vpow2.f32 %v847_v34  ;;  %724 = vadd.xlane.f32.xlu1 %v723_v35 }
 0x218   : > { %1442 = vpow2.f32 %v636_v40 }
 0x219   : > { %1444 = vpow2.f32 %v720_v43 }
 0x21d   : > { %v1644_v36 = vpop.eup %1440  ;;  %v858_v37 = vpop.permute.xlu0 %857 }
 0x21e   : > { %878 = vmatpush.msra.mxu2 %v858_v37  ;;  %v1443_v44 = vpop.eup %1442  ;;  %v853_v21 = vsel %vm604_vm1, %v1644_v36, 0.0 }
 0x21f   : > { %1365 = vmatmul.msk.f32.vlgmr.msra.gmra.mxu2 %vm604_vm1, %v1644_v36  ;;  %v638_v46 = vmul.f32 0.0, %v1443_v44  ;;  %v1445_v49 = vpop.eup %1444 }
 0x220   : > { %v722_v50 = vmul.f32 0.0, %v1445_v49 }
 0x22a   : > { %v926_v38 = vpop.permute.xlu1 %925 }
 0x22b   : > { %1367 = vmatpush.xpose.msk.msrb.mxu2 %vm604_vm1, %v926_v38 }
 0x22e   : > { %1368 = vmatmul.msk.f32.vlgmr.msrb.gmra.mxu2 %vm604_vm1, %v924_v24  ;;  %v1006_v24 = vld [vmem:[%s1654_s26 + $0x18] sm:$0xff] }
 0x22f   : > { %1025 = vmatpush.msra.mxu2 %v1006_v24 }
 0x282   : > { %v641_v47 = vpop.xlane.xlu2 %640 }
 0x283   : > { %v642_v48 = vadd.f32 %v641_v47, %v638_v46 }
 0x285   : > { %1446 = vrcp.f32 %v642_v48  ;;  %v680_v56 = vand.u32 2147483648, %v642_v48  ;;  %v678_v58 = vand.u32 2147483647, %v642_v48  ;;  %vm674_vm3 = vweird.f32 %v642_v48 }
 0x287   : > { %v681_v62 = vor.u32 1.1754944e-38, %v680_v56  ;;  %vm679_vm5 = vcmp.eq.f32.partialorder %v678_v58, 8.507059e+37 }
 0x28a   : > { %v725_v51 = vpop.xlane.xlu1 %724 }
 0x28b   : > { %v1447_v52 = vpop.eup %1446  ;;  %v726_v53 = vadd.f32 %v725_v51, %v722_v50 }
 0x28c   : > { %v670_v54 = vmul.f32 %v1447_v52, %v642_v48  ;;  %vm675_vm2 = vweird.f32 %v1447_v52 }
 0x28d   : > { %1448 = vrcp.f32 %v726_v53  ;;  %vm676_vm4 = vmor %vm674_vm3, %vm675_vm2  ;;  %v764_v4 = vand.u32 2147483648, %v726_v53  ;;  %v762_v6 = vand.u32 2147483647, %v726_v53  ;;  %vm758_vm7 = vweird.f32 %v726_v53 }
 0x28e   : > { %v671_v55 = vsub.f32 1.0, %v670_v54 }
 0x28f   : > { %v765_v8 = vor.u32 1.1754944e-38, %v764_v4  ;;  %vm763_vm9 = vcmp.eq.f32.partialorder %v762_v6, 8.507059e+37 }
 0x290   : > { %v672_v57 = vmul.f32 %v1447_v52, %v671_v55 }
 0x291   : > { %v666_v61 = vpop.f32.mrf.mxu2 }
 0x292   : > { %v673_v59 = vadd.f32 %v1447_v52, %v672_v57 }
 0x293   : > { %v1449_v60 = vpop.eup %1448 }
 0x294   : > { %v677_v63 = vsel %vm676_vm4, %v1447_v52, %v673_v59  ;;  %v754_v0 = vmul.f32 %v1449_v60, %v726_v53  ;;  %vm759_vm6 = vweird.f32 %v1449_v60 }
 0x295   : > { %v682_v1 = vsel %vm679_vm5, %v681_v62, %v677_v63  ;;  %vm760_vm8 = vmor %vm758_vm7, %vm759_vm6 }
 0x296   : > { %v683_v2 = vmul.f32 %v682_v1, %v666_v61  ;;  %v755_v3 = vsub.f32 1.0, %v754_v0  ;;  %v1431_v0 = vld [vmem:[%s537_s27] ss:$0 sm:$0xff]  ;;  %s559_s27 = scalar_lea.vmem %s1773_s10, %s1789_s18 }
 0x298   : > { %1362 = vmatmul.msk.f32.vlgmr.msra.gmra.mxu3 %vm604_vm1, %v683_v2  ;;  %v756_v5 = vmul.f32 %v1449_v60, %v755_v3 }
 0x299   : > { %v750_v10 = vpop.f32.mrf.mxu2 }
 0x29a   : > { %v757_v7 = vadd.f32 %v1449_v60, %v756_v5  ;;  %v1517_v5 = vmov 32.0  }
 0x29c   : > { %v761_v9 = vsel %vm760_vm8, %v1449_v60, %v757_v7 }
 0x29d   : > { %v766_v11 = vsel %vm763_vm9, %v765_v8, %v761_v9 }
 0x29e   : > { %v767_v12 = vmul.f32 %v766_v11, %v750_v10 }
 0x2a0   : > { %1361 = vmatmul.msk.f32.vlgmr.msrb.gmra.mxu1 %vm604_vm1, %v767_v12 }
 0x2a2   : > { %v1660_v13 = vpop.f32.mrf.mxu2 }
 0x2b1   : > { %v948_v14 = vpop.f32.mrf.mxu2 }
 0x2b2   : > { %v951_v15 = vsel %vm604_vm1, %v948_v14, -inf }
 0x2b3   : > { %952 = vmax.xlane.f32.xlu0 %v951_v15 }
 0x31b   : > { %v812_v60 = vpop.f32.mrf.mxu3 }
 0x31d   : > { %v789_v59 = vpop.f32.mrf.mxu1 }
 0x31e   : > { %v813_v61 = vadd.f32 %v812_v60, %v789_v59 }
 0x326   : > { %v953_v16 = vpop.xlane.xlu0 %952 }
 0x327   : > { %v954_v17 = vsub.f32 %v948_v14, %v953_v16  ;;  %v957_v22 = vsub.f32 -inf, %v953_v16 }
 0x329   : > { %v955_v18 = vmul.f32 1.442695, %v954_v17  ;;  %v958_v23 = vmul.f32 1.442695, %v957_v22  ;;  %v1078_v17 = vld [vmem:[%s548_s30 + $0x18] sm:$0xff]  ;;  %v1129_v22 = vld [vmem:[%s1699_s14 + $0x70] sm:$0xff] }
 0x32a   : > { %1098 = vmatpush.msrb.mxu1 %v1078_v17 }
 0x32b   : > { %1450 = vpow2.f32 %v955_v18  ;;  %v1077_v18 = vld [vmem:[%s548_s30 + $0x10] sm:$0xff] }
 0x32c   : > { %1452 = vpow2.f32 %v958_v23  ;;  %1099 = vmatpush.msrb.mxu1 %v1077_v18  ;;  %v1128_v23 = vld [vmem:[%s1699_s14 + $0x68] sm:$0xff] }
 0x32d   : > { %1454 = vpow2.f32 %v850_v27 }
 0x331   : > { %v1451_v19 = vpop.eup %1450 }
 0x332   : > { %1369 = vmatmul.msk.f32.vlgmr.msrb.gmra.mxu0 %vm604_vm1, %v1451_v19  ;;  %v961_v20 = vsel %vm604_vm1, %v1451_v19, 0.0  ;;  %v1453_v28 = vpop.eup %1452  ;;  %v1076_v19 = vld [vmem:[%s548_s30 + $0x8] sm:$0xff] }
 0x333   : > { %962 = vadd.xlane.f32.xlu0 %v961_v20  ;;  %v960_v29 = vmul.f32 0.0, %v1453_v28  ;;  %v1455_v33 = vpop.eup %1454  ;;  %v1075_v20 = vld [vmem:[%s548_s30] sm:$0xff]  ;;  %1100 = vmatpush.msrb.mxu1 %v1076_v19 }
 0x334   : > { %v852_v34 = vmul.f32 0.0, %v1455_v33 }
 0x335   : > { %1101 = vmatpush.msrb.mxu1 %v1075_v20 }
 0x33b   : > { %854 = vadd.xlane.f32.xlu0 %v853_v21  ;;  %v1130_v21 = vld [vmem:[%s1699_s14 + $0x78] sm:$0xff] }
 0x33c   : > { %1135 = vmatpush.msrb.mxu3 %v1130_v21 }
 0x33e   : > { %1136 = vmatpush.msrb.mxu3 %v1129_v22 }
 0x340   : > { %1137 = vmatpush.msrb.mxu3 %v1128_v23 }
 0x342   : > { %1138 = vmatpush.msrb.mxu3 %v1127_v26 }
 0x3a6   : > { %v963_v30 = vpop.xlane.xlu0 %962 }
 0x3a7   : > { %v964_v32 = vadd.f32 %v963_v30, %v960_v29 }
 0x3a9   : > { %1456 = vrcp.f32 %v964_v32  ;;  %v1002_v31 = vand.u32 2147483648, %v964_v32  ;;  %v1000_v41 = vand.u32 2147483647, %v964_v32  ;;  %vm996_vm11 = vweird.f32 %v964_v32 }
 0x3ab   : > { %v1003_v44 = vor.u32 1.1754944e-38, %v1002_v31  ;;  %vm1001_vm13 = vcmp.eq.f32.partialorder %v1000_v41, 8.507059e+37  ;;  %v1125_v41 = vld [vmem:[%s1699_s14 + $0x50] sm:$0xff] }
 0x3ae   : > { %v855_v35 = vpop.xlane.xlu0 %854 }
 0x3af   : > { %v1457_v36 = vpop.eup %1456  ;;  %v856_v37 = vadd.f32 %v855_v35, %v852_v34  ;;  %v988_v47 = vpop.f32.mrf.mxu0  ;;  %v1432_v35 = vld [vmem:[%s1777_s13] ss:$0 sm:$0xff] }
 0x3b0   : > { %v992_v38 = vmul.f32 %v1457_v36, %v964_v32  ;;  %vm997_vm10 = vweird.f32 %v1457_v36 }
 0x3b1   : > { %1458 = vrcp.f32 %v856_v37  ;;  %vm998_vm12 = vmor %vm996_vm11, %vm997_vm10  ;;  %v894_v51 = vand.u32 2147483648, %v856_v37  ;;  %v892_v53 = vand.u32 2147483647, %v856_v37  ;;  %vm888_vm15 = vweird.f32 %v856_v37 }
 0x3b2   : > { %v993_v39 = vsub.f32 1.0, %v992_v38  ;;  %1460 = vrcp.f32 %v1517_v5  ;;  %v1433_v38 = vld [vmem:[%s543_s16] ss:$0 sm:$0xff] }
 0x3b3   : > { %v895_v55 = vor.u32 1.1754944e-38, %v894_v51  ;;  %vm893_vm3 = vcmp.eq.f32.partialorder %v892_v53, 8.507059e+37  ;;  %v1115_v51 = vld [vmem:[%s1699_s14] sm:$0xff] }
 0x3b4   : > { %v994_v40 = vmul.f32 %v1457_v36, %v993_v39 }
 0x3b6   : > { %v995_v42 = vadd.f32 %v1457_v36, %v994_v40  ;;  %v1126_v40 = vld [vmem:[%s1699_s14 + $0x58] sm:$0xff] }
 0x3b7   : > { %v1459_v43 = vpop.eup %1458  ;;  %1139 = vmatpush.msrb.mxu3 %v1126_v40 }
 0x3b8   : > { %v884_v45 = vmul.f32 %v1459_v43, %v856_v37  ;;  %v999_v46 = vsel %vm998_vm12, %v1457_v36, %v995_v42  ;;  %vm889_vm14 = vweird.f32 %v1459_v43  ;;  %v1461_v6 = vpop.eup %1460  ;;  %v1124_v42 = vld [vmem:[%s1699_s14 + $0x48] sm:$0xff] }
 0x3b9   : > { %v1004_v48 = vsel %vm1001_vm13, %v1003_v44, %v999_v46  ;;  %vm890_vm2 = vmor %vm888_vm15, %vm889_vm14  ;;  %v1040_v7 = vmul.f32 32.0, %v1461_v6  ;;  %1140 = vmatpush.msrb.mxu3 %v1125_v41  ;;  %v1122_v44 = vld [vmem:[%s1699_s14 + $0x38] sm:$0xff]  ;;  %v1120_v46 = vld [vmem:[%s1699_s14 + $0x28] sm:$0xff] }
 0x3ba   : > { %v885_v49 = vsub.f32 1.0, %v884_v45  ;;  %v1005_v50 = vmul.f32 %v1004_v48, %v988_v47  ;;  %v1121_v45 = vld [vmem:[%s1699_s14 + $0x30] sm:$0xff]  ;;  %v1119_v47 = vld [vmem:[%s1699_s14 + $0x20] sm:$0xff]  ;;  %v1118_v48 = vld [vmem:[%s1699_s14 + $0x18] sm:$0xff] }
 0x3bb   : > { %v1041_v8 = vsub.f32 1.0, %v1040_v7  ;;  %1141 = vmatpush.msrb.mxu3 %v1124_v42 }
 0x3bc   : > { %v886_v52 = vmul.f32 %v1459_v43, %v885_v49  ;;  %1370 = vmatmul.msk.f32.vlgmr.msra.gmra.mxu2 %vm604_vm1, %v1005_v50  ;;  %v1117_v49 = vld [vmem:[%s1699_s14 + $0x10] sm:$0xff]  ;;  %v1116_v50 = vld [vmem:[%s1699_s14 + $0x8] sm:$0xff] }
 0x3bd   : > { %v1042_v9 = vmul.f32 %v1461_v6, %v1041_v8 }
 0x3be   : > { %v887_v54 = vadd.f32 %v1459_v43, %v886_v52  ;;  %v1434_v52 = vld [vmem:[%s551_s29] ss:$0 sm:$0xff] }
 0x3bf   : > { %v1043_v10 = vadd.f32 %v1461_v6, %v1042_v9 }
 0x3c0   : > { %v891_v56 = vsel %vm890_vm2, %v1459_v43, %v887_v54  ;;  %v1123_v43 = vld [vmem:[%s1699_s14 + $0x40] sm:$0xff]  ;;  %s565_s14 = sadd.s32 %s1352_s12, %s1791_s17 }
 0x3c1   : > { %v896_v57 = vsel %vm893_vm3, %v895_v55, %v891_v56  ;;  %1142 = vmatpush.msrb.mxu3 %v1123_v43  ;;  %s1353_s0 = sshll.u32 %s565_s14, 3 }
 0x3c2   : > { %v897_v58 = vmul.f32 %v896_v57, %v1660_v13  ;;  %s567_s25 = scalar_lea.vmem %s1774_s11, %s1353_s0 }
 0x3c3   : > { %1143 = vmatpush.msrb.mxu3 %v1122_v44 }
 0x3c4   : > { %1366 = vmatmul.msk.f32.vlgmr.msra.gmra.mxu1 %vm604_vm1, %v897_v58  ;;  %vm1044_vm1 = vweird.f32 %v1461_v6 }
 0x3c5   : > { %v1045_v11 = vsel %vm1044_vm1, %v1461_v6, %v1043_v10  ;;  %1144 = vmatpush.msrb.mxu3 %v1121_v45 }
 0x3c7   : > { %1145 = vmatpush.msrb.mxu3 %v1120_v46 }
 0x3c9   : > { %1146 = vmatpush.msrb.mxu3 %v1119_v47 }
 0x3cb   : > { %1147 = vmatpush.msrb.mxu3 %v1118_v48 }
 0x3cd   : > { %1148 = vmatpush.msrb.mxu3 %v1117_v49 }
 0x3cf   : > { %1149 = vmatpush.msrb.mxu3 %v1116_v50 }
 0x3d1   : > { %1150 = vmatpush.msrb.mxu3 %v1115_v51 }
 0x43f   : > { %v1027_v1 = vpop.f32.mrf.mxu2 }
 0x441   : > { %v919_v62 = vpop.f32.mrf.mxu1 }
 0x442   : > { %v922_v63 = vadd.f32 %v919_v62, %v813_v61 }
 0x444   : > { %v1030_v2 = vadd.f32 %v1027_v1, %v922_v63 }
 0x446   : > { %v1035_v3 = vadd.f32 %v1431_v0, %v1030_v2  ;;  %v1435_v0 = vld [vmem:[%s559_s27] ss:$0 sm:$0xff] }
 0x448   : > { %v1036_v4 = vsel %vm577_vm0, %v1035_v3, 0.0 }
 0x449   : > { %1037 = vadd.xlane.f32.xlu2 %v1036_v4 }
 0x4bc   : > { %v1038_v12 = vpop.xlane.xlu2 %1037 }
 0x4bd   : > { %v1046_v13 = vmul.f32 %v1045_v11, %v1038_v12 }
 0x4bf   : > { %v1047_v14 = vsub.f32 %v1035_v3, %v1046_v13 }
 0x4c1   : > { %v1048_v15 = vmul.f32 %v1047_v14, %v1047_v14 }
 0x4c3   : > { %v1049_v16 = vsel %vm577_vm0, %v1048_v15, 0.0 }
 0x4c4   : > { %1050 = vadd.xlane.f32.xlu1 %v1049_v16 }
 0x537   : > { %v1051_v24 = vpop.xlane.xlu1 %1050 }
 0x538   : > { %v1052_v25 = vmul.f32 %v1051_v24, %v1045_v11 }
 0x53a   : > { %v1053_v27 = vadd.f32 1e-05, %v1052_v25 }
 0x53c   : > { %1462 = vrsqrt.f32 %v1053_v27  ;;  %vm1060_vm5 = vweird.f32 %v1053_v27 }
 0x542   : > { %v1463_v28 = vpop.eup %1462 }
 0x543   : > { %v1055_v29 = vmul.f32 %v1463_v28, %v1053_v27  ;;  %vm1061_vm4 = vweird.f32 %v1463_v28 }
 0x544   : > { %vm1062_vm6 = vmor %vm1060_vm5, %vm1061_vm4 }
 0x545   : > { %v1056_v30 = vmul.f32 %v1463_v28, %v1055_v29 }
 0x547   : > { %v1057_v32 = vmul.f32 0.5, %v1056_v30 }
 0x549   : > { %v1058_v33 = vsub.f32 1.5, %v1057_v32 }
 0x54b   : > { %v1059_v34 = vmul.f32 %v1463_v28, %v1058_v33 }
 0x54d   : > { %v1063_v36 = vsel %vm1062_vm6, %v1463_v28, %v1059_v34 }
 0x54e   : > { %v1064_v37 = vmul.f32 %v1063_v36, %v1047_v14 }
 0x550   : > { %v1069_v39 = vmul.f32 %v1432_v35, %v1064_v37 }
 0x552   : > { %v1074_v31 = vadd.f32 %v1433_v38, %v1069_v39 }
 0x554   : > { %1371 = vmatmul.msk.f32.vlgmr.msrb.gmra.mxu1 %vm577_vm0, %v1074_v31 }
 0x5d1   : > { %v1103_v53 = vpop.f32.mrf.mxu1 }
 0x5d2   : > { %v1104_v54 = vadd.f32 %v1434_v52, %v1103_v53 }
 0x5d4   : > { %v1107_v55 = vmul.f32 %v1104_v54, %v1104_v54  ;;  %v1106_v61 = vmul.f32 0.5, %v1104_v54 }
 0x5d6   : > { %v1108_v56 = vmul.f32 %v1107_v55, %v1104_v54 }
 0x5d8   : > { %v1109_v57 = vmul.f32 0.044715, %v1108_v56 }
 0x5da   : > { %v1110_v58 = vadd.f32 %v1109_v57, %v1104_v54 }
 0x5dc   : > { %v1111_v59 = vmul.f32 0.7978846, %v1110_v58 }
 0x5de   : > { %1464 = vtanh.f32 %v1111_v59 }
 0x5e4   : > { %v1465_v60 = vpop.eup %1464 }
 0x5e5   : > { %v1113_v62 = vadd.f32 1.0, %v1465_v60 }
 0x5e7   : > { %v1114_v63 = vmul.f32 %v1113_v62, %v1106_v61 }
 0x5e9   : > { %1151 = vmatmul.f32.vlgmr.msrb.gmra.mxu3 %v1114_v63 }
 0x66c   : > { %v1152_v1 = vpop.f32.mrf.mxu3 }
 0x66d   : > { %v1153_v2 = vadd.f32 %v1435_v0, %v1152_v1 }
 0x66f   : > { %1155 = vst.msk [vmem:[%s567_s25] sm:$0xff] %vm577_vm0, %v1153_v2 }
 0x670 PF: > { %s21_s21 = sadd.s32 1, %s1504_s21   ;;  %s1778_s17 = smov %s1496_s19 }
 0x671   : > { %p18_p7 = scmp.ge.s32.totalorder %s21_s21, 6   ;;  %s1779_s18 = smov %s1500_s20 }
 0x672   : > { %s1780_s19 = smov %s1783_s22  ;;  %s1781_s20 = smov %s1787_s23 }
 0x673   :  { %20 = sbr.rel (!%p18_p7) target bundleno = 3 (0x3), region = 124 }

</bundles_post_ra>
